<compile_context>
chip_gen: v5e
topology: v5e:2x2
jax: 0.10.0
libtpu: 0.0.40
codegen_flags: <defaults>
</compile_context>

<pallas_src>
import functools

import jax
import jax.numpy as jnp
from jax import lax
from jax.experimental import pallas as pl
from jax.experimental.pallas import tpu as pltpu

# Well under v7x's 64 MiB physical VMEM; actual tile usage is a few MiB.
_VMEM_LIMIT_BYTES = 32 * 1024 * 1024


def _round_up(x, m):
    return (x + m - 1) // m * m


def _pick_tm(m):
    """M tile: multiple of 16 (bf16 sublane packing).  For larger M, split across
    >= 2 tiles so v7x's second TensorCore gets work via the 'parallel' grid axis,
    while keeping padding minimal (tm divides M whenever M is a multiple of 16)."""
    if m <= 128:
        return _round_up(m, 16)
    half = _round_up((m + 1) // 2, 16)
    return min(256, half)


# ------------------------------------------------------------------ GEMM kernels
def _gemm_kernel(x_ref, w_ref, b_ref, o_ref, *, act, in_relu):
    x = x_ref[...]
    if in_relu:                       # fused prologue ReLU (commutes with im2col)
        x = jnp.maximum(x, 0)
    y = jnp.dot(x, w_ref[...], preferred_element_type=jnp.float32) + b_ref[...]
    if act == "relu":
        y = jnp.maximum(y, 0.0)
    o_ref[...] = y.astype(o_ref.dtype)


def _gemm_res_kernel(x_ref, w_ref, b_ref, r_ref, o_ref, *, act, in_relu):
    x = x_ref[...]
    if in_relu:
        x = jnp.maximum(x, 0)
    y = (jnp.dot(x, w_ref[...], preferred_element_type=jnp.float32)
         + b_ref[...] + r_ref[...].astype(jnp.float32))
    if act == "relu":
        y = jnp.maximum(y, 0.0)
    o_ref[...] = y.astype(o_ref.dtype)


# ------------------------------------------------------------------ GEMM wrapper
def pallas_gemm(x, w, b, *, act="none", in_relu=False, residual=None,
                out_dtype=jnp.bfloat16):
    """(M, K) @ (K, N) + b [+ residual], with fused prologue/epilogue ReLU.

    K and N are kept at their natural (unpadded) sizes, each covered by a single
    full-dim block (always legal), so there is no K grid axis, no accumulator
    scratch, and no per-call pad/cast/slice copies.  Only M is tiled ('parallel').
    Weights/biases arrive pre-transposed / bf16-packed from pack_params.
    """
    M, K = x.shape
    K2, N = w.shape
    assert K == K2
    # Single-K-block specialization: every GEMM in this model (even at production
    # widths) has K well under this bound, so x/w K-slabs always fit in VMEM.
    assert K <= 4096, "K too large for the single-block GEMM specialization"

    x = x.astype(jnp.bfloat16)
    tm = _pick_tm(M)
    mp = _round_up(M, tm)
    if mp != M:
        x = jnp.pad(x, ((0, mp - M), (0, 0)))
    grid = (mp // tm,)

    in_specs = [
        pl.BlockSpec((tm, K), lambda i: (i, 0)),
        pl.BlockSpec((K, N), lambda i: (0, 0)),
        pl.BlockSpec((1, N), lambda i: (0, 0)),
    ]
    args = [x, w, b]
    out_bytes = mp * N * (2 if out_dtype == jnp.bfloat16 else 4)
    bytes_accessed = x.size * 2 + w.size * 2 + b.size * 4 + out_bytes

    if residual is not None:
        r = residual.astype(jnp.bfloat16)
        if mp != M:
            r = jnp.pad(r, ((0, mp - M), (0, 0)))
        in_specs.append(pl.BlockSpec((tm, N), lambda i: (i, 0)))
        args.append(r)
        bytes_accessed += r.size * 2
        kernel = functools.partial(_gemm_res_kernel, act=act, in_relu=in_relu)
    else:
        kernel = functools.partial(_gemm_kernel, act=act, in_relu=in_relu)

    out = pl.pallas_call(
        kernel,
        out_shape=jax.ShapeDtypeStruct((mp, N), out_dtype),
        grid_spec=pltpu.PrefetchScalarGridSpec(
            num_scalar_prefetch=0,
            grid=grid,
            in_specs=in_specs,
            out_specs=pl.BlockSpec((tm, N), lambda i: (i, 0)),
        ),
        compiler_params=pltpu.CompilerParams(
            dimension_semantics=("parallel",),
            vmem_limit_bytes=_VMEM_LIMIT_BYTES,
        ),
        cost_estimate=pl.CostEstimate(
            flops=2 * mp * K * N,
            transcendentals=0,
            bytes_accessed=int(bytes_accessed),
        ),
    )(*args)
    return out if mp == M else out[:M]


# ---------------------------------------------- fused pre-quant conv + VQ + post-quant conv
def _vq_fused_kernel(h_ref, wpre_ref, bpre_ref, e_ref, ee_ref, wpost_ref, bpost_ref,
                     q_ref, dec_ref, idx_ref, lpart_ref, *, m_real, tm):
    i = pl.program_id(0)

    # fused pre-quant 1x1 conv (prologue ReLU = encoder residual stack's trailing ReLU)
    h = jnp.maximum(h_ref[...], 0)                                          # (tm, NH) bf16
    z = jnp.dot(h, wpre_ref[...], preferred_element_type=jnp.float32) + bpre_ref[...]

    # nearest-codebook search: ||z||^2 is row-constant (dropped), ||e||^2 is
    # precomputed at pack time (ee_ref), cross term runs in bf16 on the MXU.
    e = e_ref[...]                                                          # (Kc, D) f32
    cross = lax.dot_general(z.astype(jnp.bfloat16), e.astype(jnp.bfloat16),
                            (((1,), (1,)), ((), ())),
                            preferred_element_type=jnp.float32)             # (tm, Kc)
    d = ee_ref[...] - 2.0 * cross
    col = lax.broadcasted_iota(jnp.int32, d.shape, 1)
    min_d = jnp.min(d, axis=-1, keepdims=True)
    kc = d.shape[1]
    # argmin with ties-to-lowest-index (matches torch.argmin)
    idx = jnp.min(jnp.where(d == min_d, col, kc), axis=-1, keepdims=True)   # (tm, 1)
    onehot = (col == idx).astype(jnp.float32)                               # (tm, Kc)
    q = jnp.dot(onehot, e, preferred_element_type=jnp.float32)              # exact gather e[idx]

    q_ref[...] = q
    idx_ref[...] = idx.astype(jnp.int32)

    # fused post-quant 1x1 conv -> bf16 decoder input
    dec = (jnp.dot(q.astype(jnp.bfloat16), wpost_ref[...],
                   preferred_element_type=jnp.float32) + bpost_ref[...])
    dec_ref[...] = dec.astype(dec_ref.dtype)

    # per-tile partial MSE in a lane-dense (8,128) block so the M axis stays
    # 'parallel' (v7x: both TensorCores); reduced to the scalar loss in XLA.
    row = lax.broadcasted_iota(jnp.int32, (tm, 1), 0) + i * tm
    diff = (q - z) * (row < m_real).astype(jnp.float32)
    part = jnp.sum(diff * diff, keepdims=True)                              # (1, 1)
    r8 = lax.broadcasted_iota(jnp.int32, (8, 128), 0)
    c128 = lax.broadcasted_iota(jnp.int32, (8, 128), 1)
    lpart_ref[...] = jnp.where((r8 == 0) & (c128 == 0), part, 0.0)


def pallas_vq_postconv(h, wpre, bpre, codebook, codebook_sq, wpost, bpost):
    """Fused pre-quant 1x1 conv (+ prologue ReLU) -> nearest-codebook VQ ->
    post-quant 1x1 conv.  Returns (q (M,D) f32, dec_in (M,NH) bf16, idx (M,) i32,
    mse scalar f32).  Only M is tiled; all other dims use full-dim blocks."""
    M, nhin = h.shape
    D = codebook.shape[1]
    nhout = wpost.shape[1]

    h = h.astype(jnp.bfloat16)
    tm = _pick_tm(M)
    mp = _round_up(M, tm)
    if mp != M:
        h = jnp.pad(h, ((0, mp - M), (0, 0)))
    ntiles = mp // tm

    kernel = functools.partial(_vq_fused_kernel, m_real=M, tm=tm)
    q, dec, idx, lpart = pl.pallas_call(
        kernel,
        out_shape=(
            jax.ShapeDtypeStruct((mp, D), jnp.float32),
            jax.ShapeDtypeStruct((mp, nhout), jnp.bfloat16),
            jax.ShapeDtypeStruct((mp, 1), jnp.int32),
            jax.ShapeDtypeStruct((8 * ntiles, 128), jnp.float32),
        ),
        grid_spec=pltpu.PrefetchScalarGridSpec(
            num_scalar_prefetch=0,
            grid=(ntiles,),
            in_specs=[
                pl.BlockSpec((tm, nhin), lambda i: (i, 0)),
                pl.BlockSpec((nhin, D), lambda i: (0, 0)),
                pl.BlockSpec((1, D), lambda i: (0, 0)),
                pl.BlockSpec(codebook.shape, lambda i: (0, 0)),
                pl.BlockSpec(codebook_sq.shape, lambda i: (0, 0)),
                pl.BlockSpec((D, nhout), lambda i: (0, 0)),
                pl.BlockSpec((1, nhout), lambda i: (0, 0)),
            ],
            out_specs=(
                pl.BlockSpec((tm, D), lambda i: (i, 0)),
                pl.BlockSpec((tm, nhout), lambda i: (i, 0)),
                pl.BlockSpec((tm, 1), lambda i: (i, 0)),
                pl.BlockSpec((8, 128), lambda i: (i, 0)),
            ),
        ),
        compiler_params=pltpu.CompilerParams(
            dimension_semantics=("parallel",),
            vmem_limit_bytes=_VMEM_LIMIT_BYTES,
        ),
        cost_estimate=pl.CostEstimate(
            flops=2 * mp * D * (nhin + 2 * codebook.shape[0] + nhout),
            transcendentals=0,
            bytes_accessed=int(h.size * 2 + mp * (D * 4 + nhout * 2 + 4)),
        ),
    )(h, wpre, bpre, codebook, codebook_sq, wpost, bpost)

    mse = jnp.sum(lpart) / jnp.float32(M * D)
    if mp != M:
        q, dec, idx = q[:M], dec[:M], idx[:M]
    return q, dec, idx[:, 0], mse


# -------------------------------------------------------------------- conv glue
def _im2col(x, kh, kw, stride, pad):
    # TODO(synk): gather conv patches in-kernel (tap accumulation over shifted
    # windows) to avoid materializing this matrix in HBM; it is built with XLA
    # glue, but now in bf16 and at the true (unpadded) channel width.
    if pad > 0:
        x = jnp.pad(x, ((0, 0), (pad, pad), (pad, pad), (0, 0)))
    n, h, w, c = x.shape
    oh = (h - kh) // stride + 1
    ow = (w - kw) // stride + 1
    cols = []
    for i in range(kh):
        for j in range(kw):
            cols.append(x[:, i:i + stride * (oh - 1) + 1:stride,
                          j:j + stride * (ow - 1) + 1:stride, :])
    cols = jnp.concatenate(cols, axis=-1)                # (N, oh, ow, kh*kw*C)
    return cols.reshape(n * oh * ow, kh * kw * c), (n, oh, ow)


def conv2d(x, w2d, b2d, *, kh, kw, stride=1, pad=0, act="none", in_relu=False,
           out_dtype=jnp.bfloat16):
    cols, (n, oh, ow) = _im2col(x, kh, kw, stride, pad)
    y = pallas_gemm(cols, w2d, b2d, act=act, in_relu=in_relu, out_dtype=out_dtype)
    return y.reshape(n, oh, ow, w2d.shape[1])


def conv_transpose2d(x, w2d, b2d, *, act="none", in_relu=False,
                     out_dtype=jnp.bfloat16):
    # 4x4 / stride-2 / pad-1 ConvTranspose2d, rewritten at pack time as a 3x3
    # stride-1 conv with 4x output channels followed by a 2x2 pixel shuffle.
    oc = w2d.shape[1] // 4
    y = conv2d(x, w2d, b2d, kh=3, kw=3, stride=1, pad=1, act=act, in_relu=in_relu,
               out_dtype=out_dtype)
    n, h, w, _ = y.shape
    y = y.reshape(n, h, w, 2, 2, oc)                     # (n, m, w, r, s, c)
    y = jnp.transpose(y, (0, 1, 3, 2, 4, 5))             # (n, m, r, w, s, c)
    # TODO(synk): fuse the pixel shuffle into the GEMM output index_map to avoid
    # this HBM transpose over the largest decoder activation.
    return y.reshape(n, 2 * h, 2 * w, oc)


def residual_stack(x, blocks):
    # Sonnet-style block: h = h + conv1x1(relu(conv3x3(relu(h)))).
    # Leading ReLU fused as the conv3x3 GEMM prologue; the conv1x1 GEMM fuses the
    # residual add.  NOTE: the stack's trailing ReLU is NOT applied here -- it is
    # fused into the consumer's prologue (in_relu=True).
    n, h, w, c = x.shape
    for blk in blocks:
        t = conv2d(x, blk["w3"], blk["b3"], kh=3, kw=3, stride=1, pad=1,
                   act="relu", in_relu=True)
        y = pallas_gemm(t.reshape(-1, t.shape[-1]), blk["w1"], blk["b1"],
                        residual=x.reshape(-1, c))
        x = y.reshape(n, h, w, c)
    return x


# ------------------------------------------------------------------------ parameters
def init_params(key, cfg):
    # PyTorch-layout parameters (Conv2d: (oc, ic, kh, kw); ConvTranspose2d:
    # (ic, oc, kh, kw)), as the original module would hold them.
    ch, nh = cfg["in_channels"], cfg["num_hiddens"]
    nrh, nrl = cfg["num_residual_hiddens"], cfg["num_residual_layers"]
    ld, cb = cfg["latent_dim"], cfg["codebook_size"]
    keys = iter(jax.random.split(key, 64))

    def w(shape, scale=0.05):
        return jax.random.normal(next(keys), shape, jnp.float32) * scale

    def res_blocks():
        return [
            {"w3": w((nrh, nh, 3, 3)), "b3": w((nrh,)),
             "w1": w((nh, nrh, 1, 1)), "b1": w((nh,))}
            for _ in range(nrl)
        ]

    return {
        "enc_c1_w": w((nh // 2, ch, 4, 4)), "enc_c1_b": w((nh // 2,)),
        "enc_c2_w": w((nh, nh // 2, 4, 4)), "enc_c2_b": w((nh,)),
        "enc_c3_w": w((nh, nh, 3, 3)), "enc_c3_b": w((nh,)),
        "enc_res": res_blocks(),
        "pre_q_w": w((ld, nh, 1, 1)), "pre_q_b": w((ld,)),
        "codebook": w((cb, ld), scale=1.0 / cb),
        "post_q_w": w((nh, ld, 1, 1)), "post_q_b": w((nh,)),
        "dec_c1_w": w((nh, nh, 3, 3)), "dec_c1_b": w((nh,)),
        "dec_res": res_blocks(),
        "dec_t1_w": w((nh, nh // 2, 4, 4)), "dec_t1_b": w((nh // 2,)),
        "dec_t2_w": w((nh // 2, ch, 4, 4)), "dec_t2_b": w((ch,)),
    }


def _pack_conv(w, b):
    # PyTorch Conv2d weight (oc, ic, kh, kw) -> GEMM weight (kh*kw*ic, oc) bf16.
    oc, ic, kh, kw = w.shape
    w2d = jnp.transpose(w, (2, 3, 1, 0)).reshape(kh * kw * ic, oc)
    return w2d.astype(jnp.bfloat16), b.reshape(1, oc).astype(jnp.float32)


def _convtranspose_subpixel_weights(w):
    """Rewrite a 4x4 / stride-2 / pad-1 ConvTranspose2d weight (ic, oc, 4, 4) as an
    equivalent 3x3 stride-1 pad-1 Conv2d weight with 4*oc outputs (one per output
    parity class), to be followed by a 2x2 pixel shuffle."""
    ic, oc, kh, kw = w.shape
    assert (kh, kw) == (4, 4)
    # parity -> [(3x3 conv tap index, transposed-kernel tap index)]
    taps = {0: [(0, 3), (1, 1)], 1: [(1, 2), (2, 0)]}
    weq = jnp.zeros((2, 2, oc, ic, 3, 3), jnp.float32)
    for r, row_taps in taps.items():
        for s, col_taps in taps.items():
            for t, ka in row_taps:
                for u, kb in col_taps:
                    weq = weq.at[r, s, :, :, t, u].set(
                        jnp.transpose(w[:, :, ka, kb]).astype(jnp.float32))
    return weq.reshape(2 * 2 * oc, ic, 3, 3)


def _pack_convT(w, b):
    weq = _convtranspose_subpixel_weights(w)
    beq = jnp.tile(b.astype(jnp.float32), 4)             # bias per parity class
    return _pack_conv(weq, beq)


def pack_params(p):
    """One-time conversion of PyTorch-layout weights to kernel-ready layouts
    (run once, OUTSIDE the jitted forward): GEMM weights transposed + bf16,
    biases (1, N) f32, ConvTranspose2d rewritten as subpixel 3x3 convs,
    ||e||^2 precomputed for the VQ kernel."""
    def res(blocks):
        out = []
        for blk in blocks:
            w3, b3 = _pack_conv(blk["w3"], blk["b3"])
            w1, b1 = _pack_conv(blk["w1"], blk["b1"])
            out.append({"w3": w3, "b3": b3, "w1": w1, "b1": b1})
        return out

    ld = p["pre_q_w"].shape[0]
    nh = p["post_q_w"].shape[0]
    packed = {}
    packed["enc_c1_w"], packed["enc_c1_b"] = _pack_conv(p["enc_c1_w"], p["enc_c1_b"])
    packed["enc_c2_w"], packed["enc_c2_b"] = _pack_conv(p["enc_c2_w"], p["enc_c2_b"])
    packed["enc_c3_w"], packed["enc_c3_b"] = _pack_conv(p["enc_c3_w"], p["enc_c3_b"])
    packed["enc_res"] = res(p["enc_res"])
    packed["pre_q_w"] = p["pre_q_w"].reshape(ld, -1).T.astype(jnp.bfloat16)     # (nh, ld)
    packed["pre_q_b"] = p["pre_q_b"].reshape(1, ld).astype(jnp.float32)
    packed["codebook"] = p["codebook"].astype(jnp.float32)                      # (cb, ld)
    packed["codebook_sq"] = jnp.sum(packed["codebook"] ** 2, axis=-1,
                                    keepdims=True).T                            # (1, cb)
    packed["post_q_w"] = p["post_q_w"].reshape(nh, ld).T.astype(jnp.bfloat16)   # (ld, nh)
    packed["post_q_b"] = p["post_q_b"].reshape(1, nh).astype(jnp.float32)
    packed["dec_c1_w"], packed["dec_c1_b"] = _pack_conv(p["dec_c1_w"], p["dec_c1_b"])
    packed["dec_res"] = res(p["dec_res"])
    packed["dec_t1_w"], packed["dec_t1_b"] = _pack_convT(p["dec_t1_w"], p["dec_t1_b"])
    packed["dec_t2_w"], packed["dec_t2_b"] = _pack_convT(p["dec_t2_w"], p["dec_t2_b"])
    return packed


# ---------------------------------------------------------------------- full forward
def resnet_vqvae_forward(params, x_nchw):
    p = params
    x = jnp.transpose(x_nchw, (0, 2, 3, 1)).astype(jnp.bfloat16)     # NCHW -> NHWC bf16

    # encoder
    h = conv2d(x, p["enc_c1_w"], p["enc_c1_b"], kh=4, kw=4, stride=2, pad=1, act="relu")
    h = conv2d(h, p["enc_c2_w"], p["enc_c2_b"], kh=4, kw=4, stride=2, pad=1, act="relu")
    h = conv2d(h, p["enc_c3_w"], p["enc_c3_b"], kh=3, kw=3, stride=1, pad=1)
    h = residual_stack(h, p["enc_res"])

    n, hl, wl, nh = h.shape
    ld = p["codebook"].shape[1]

    # fused: pre-quant 1x1 conv (absorbs the encoder stack's trailing ReLU) ->
    # nearest-codebook VQ -> post-quant 1x1 conv
    q, dec_in, idx, mse = pallas_vq_postconv(
        h.reshape(-1, nh), p["pre_q_w"], p["pre_q_b"],
        p["codebook"], p["codebook_sq"], p["post_q_w"], p["post_q_b"])

    quant_out = jnp.transpose(q.reshape(n, hl, wl, ld), (0, 3, 1, 2))  # NCHW like PyTorch
    quant_idxs = idx.reshape(n, hl, wl)
    # Forward-only: codebook / commitment losses have identical values (they differ
    # only in gradient stopping, which is a training-time concern).
    quant_losses = {"codebook_loss": mse, "commitment_loss": mse}

    # decoder
    d = dec_in.reshape(n, hl, wl, nh)
    d = conv2d(d, p["dec_c1_w"], p["dec_c1_b"], kh=3, kw=3, stride=1, pad=1)
    d = residual_stack(d, p["dec_res"])
    d = conv_transpose2d(d, p["dec_t1_w"], p["dec_t1_b"],
                         act="relu", in_relu=True)       # in_relu = stack's trailing ReLU
    out = conv_transpose2d(d, p["dec_t2_w"], p["dec_t2_b"], out_dtype=jnp.float32)
    out = jnp.transpose(out, (0, 3, 1, 2)).astype(jnp.float32)         # NHWC -> NCHW

    return {
        "generated_image": out,
        "quantized_output": quant_out,
        "quantized_losses": quant_losses,
        "quantized_indices": quant_idxs,
    }


if __name__ == "__main__":
    cfg = dict(
        in_channels=3,
        num_hiddens=32,
        num_residual_hiddens=16,
        num_residual_layers=2,
        latent_dim=8,
        codebook_size=16,
    )
    key = jax.random.PRNGKey(0)
    pkey, xkey = jax.random.split(key)
    params = pack_params(init_params(pkey, cfg))          # one-time weight packing
    x = jax.random.normal(xkey, (2, 3, 16, 16), jnp.float32)           # NCHW input

    fwd = jax.jit(resnet_vqvae_forward)
    out = fwd(params, x)
    out = jax.tree_util.tree_map(jax.block_until_ready, out)

    assert out["generated_image"].shape == (2, 3, 16, 16)
    assert out["quantized_output"].shape == (2, 8, 4, 4)
    assert out["quantized_indices"].shape == (2, 4, 4)
    assert out["quantized_losses"]["codebook_loss"].shape == ()
    print("KERNEL_OK")
</pallas_src>

<mosaic_0001>
module attributes {stable_mosaic.version = 11 : i64} {
  func.func @_gemm_kernel(%arg0: i32, %arg1: memref<128x48xbf16, #tpu.memory_space<vmem>>, %arg2: memref<48x16xbf16, #tpu.memory_space<vmem>>, %arg3: memref<1x16xf32, #tpu.memory_space<vmem>>, %arg4: memref<128x16xbf16, #tpu.memory_space<vmem>>) attributes {dimension_semantics = [#tpu.dimension_semantics<parallel>], iteration_bounds = array<i64: 1>, scalar_prefetch = 0 : i64, scratch_operands = 0 : i64, tpu.core_type = #tpu.core_type<tc>, window_params = [{transform_indices = @transform_0, window_bounds = array<i64: 128, 48>}, {pipeline_mode = #tpu.pipeline_mode<synchronous>, transform_indices = @transform_1, window_bounds = array<i64: 48, 16>}, {pipeline_mode = #tpu.pipeline_mode<synchronous>, transform_indices = @transform_2, window_bounds = array<i64: 1, 16>}, {transform_indices = @transform_3, window_bounds = array<i64: 128, 16>}]} {
    %c0 = arith.constant 0 : index
    %c0_0 = arith.constant 0 : index
    %0 = vector.load %arg1[%c0, %c0_0] : memref<128x48xbf16, #tpu.memory_space<vmem>>, vector<128x48xbf16>
    %c0_1 = arith.constant 0 : index
    %c0_2 = arith.constant 0 : index
    %1 = vector.load %arg2[%c0_1, %c0_2] : memref<48x16xbf16, #tpu.memory_space<vmem>>, vector<48x16xbf16>
    %cst = arith.constant dense<0.000000e+00> : vector<128x16xf32>
    %2 = tpu.matmul %0, %1, %cst {dimension_numbers = #tpu.dot_dimension_numbers<[1], [0], [0], [1], [0, 0, 1, 1], [], []>} : vector<128x48xbf16>, vector<48x16xbf16>, vector<128x16xf32> -> vector<128x16xf32>
    %c0_3 = arith.constant 0 : index
    %c0_4 = arith.constant 0 : index
    %3 = vector.load %arg3[%c0_3, %c0_4] : memref<1x16xf32, #tpu.memory_space<vmem>>, vector<1x16xf32>
    %4 = vector.broadcast %3 : vector<1x16xf32> to vector<128x16xf32>
    %5 = arith.addf %2, %4 : vector<128x16xf32>
    %cst_5 = arith.constant 0.000000e+00 : f32
    %6 = vector.broadcast %cst_5 : f32 to vector<128x16xf32>
    %7 = arith.maximumf %5, %6 : vector<128x16xf32>
    %8 = arith.truncf %7 : vector<128x16xf32> to vector<128x16xbf16>
    %c0_6 = arith.constant 0 : index
    %c0_7 = arith.constant 0 : index
    %9 = vector.load %arg4[%c0_6, %c0_7] : memref<128x16xbf16, #tpu.memory_space<vmem>>, vector<128x16xbf16>
    tpu.vector_store %arg4[%c0_6, %c0_7], %8 {strides = array<i32>} : memref<128x16xbf16, #tpu.memory_space<vmem>>, vector<128x16xbf16>,
    return
  }
  func.func @transform_0(%arg0: i32) -> (i32, i32) {
    %c0_i32 = arith.constant 0 : i32
    %c0_i32_0 = arith.constant 0 : i32
    return %arg0, %c0_i32 : i32, i32
  }
  func.func @transform_1(%arg0: i32) -> (i32, i32) {
    %c0_i32 = arith.constant 0 : i32
    %c0_i32_0 = arith.constant 0 : i32
    %c0_i32_1 = arith.constant 0 : i32
    return %c0_i32, %c0_i32_0 : i32, i32
  }
  func.func @transform_2(%arg0: i32) -> (i32, i32) {
    %c0_i32 = arith.constant 0 : i32
    %c0_i32_0 = arith.constant 0 : i32
    %c0_i32_1 = arith.constant 0 : i32
    return %c0_i32, %c0_i32_0 : i32, i32
  }
  func.func @transform_3(%arg0: i32) -> (i32, i32) {
    %c0_i32 = arith.constant 0 : i32
    %c0_i32_0 = arith.constant 0 : i32
    return %arg0, %c0_i32 : i32, i32
  }
}

module attributes {stable_mosaic.version = 11 : i64} {
  func.func @_gemm_kernel(%arg0: i32, %arg1: memref<32x288xbf16, #tpu.memory_space<vmem>>, %arg2: memref<288x32xbf16, #tpu.memory_space<vmem>>, %arg3: memref<1x32xf32, #tpu.memory_space<vmem>>, %arg4: memref<32x32xbf16, #tpu.memory_space<vmem>>) attributes {dimension_semantics = [#tpu.dimension_semantics<parallel>], iteration_bounds = array<i64: 1>, scalar_prefetch = 0 : i64, scratch_operands = 0 : i64, tpu.core_type = #tpu.core_type<tc>, window_params = [{transform_indices = @transform_0, window_bounds = array<i64: 32, 288>}, {pipeline_mode = #tpu.pipeline_mode<synchronous>, transform_indices = @transform_1, window_bounds = array<i64: 288, 32>}, {pipeline_mode = #tpu.pipeline_mode<synchronous>, transform_indices = @transform_2, window_bounds = array<i64: 1, 32>}, {transform_indices = @transform_3, window_bounds = array<i64: 32, 32>}]} {
    %c0 = arith.constant 0 : index
    %c0_0 = arith.constant 0 : index
    %0 = vector.load %arg1[%c0, %c0_0] : memref<32x288xbf16, #tpu.memory_space<vmem>>, vector<32x288xbf16>
    %c0_1 = arith.constant 0 : index
    %c0_2 = arith.constant 0 : index
    %1 = vector.load %arg2[%c0_1, %c0_2] : memref<288x32xbf16, #tpu.memory_space<vmem>>, vector<288x32xbf16>
    %cst = arith.constant dense<0.000000e+00> : vector<32x32xf32>
    %2 = tpu.matmul %0, %1, %cst {dimension_numbers = #tpu.dot_dimension_numbers<[1], [0], [0], [1], [0, 0, 1, 1], [], []>} : vector<32x288xbf16>, vector<288x32xbf16>, vector<32x32xf32> -> vector<32x32xf32>
    %c0_3 = arith.constant 0 : index
    %c0_4 = arith.constant 0 : index
    %3 = vector.load %arg3[%c0_3, %c0_4] : memref<1x32xf32, #tpu.memory_space<vmem>>, vector<1x32xf32>
    %4 = vector.broadcast %3 : vector<1x32xf32> to vector<32x32xf32>
    %5 = arith.addf %2, %4 : vector<32x32xf32>
    %6 = arith.truncf %5 : vector<32x32xf32> to vector<32x32xbf16>
    %c0_5 = arith.constant 0 : index
    %c0_6 = arith.constant 0 : index
    %7 = vector.load %arg4[%c0_5, %c0_6] : memref<32x32xbf16, #tpu.memory_space<vmem>>, vector<32x32xbf16>
    tpu.vector_store %arg4[%c0_5, %c0_6], %6 {strides = array<i32>} : memref<32x32xbf16, #tpu.memory_space<vmem>>, vector<32x32xbf16>,
    return
  }
  func.func @transform_0(%arg0: i32) -> (i32, i32) {
    %c0_i32 = arith.constant 0 : i32
    %c0_i32_0 = arith.constant 0 : i32
    return %arg0, %c0_i32 : i32, i32
  }
  func.func @transform_1(%arg0: i32) -> (i32, i32) {
    %c0_i32 = arith.constant 0 : i32
    %c0_i32_0 = arith.constant 0 : i32
    %c0_i32_1 = arith.constant 0 : i32
    return %c0_i32, %c0_i32_0 : i32, i32
  }
  func.func @transform_2(%arg0: i32) -> (i32, i32) {
    %c0_i32 = arith.constant 0 : i32
    %c0_i32_0 = arith.constant 0 : i32
    %c0_i32_1 = arith.constant 0 : i32
    return %c0_i32, %c0_i32_0 : i32, i32
  }
  func.func @transform_3(%arg0: i32) -> (i32, i32) {
    %c0_i32 = arith.constant 0 : i32
    %c0_i32_0 = arith.constant 0 : i32
    return %arg0, %c0_i32 : i32, i32
  }
}

module attributes {stable_mosaic.version = 11 : i64} {
  func.func @_gemm_kernel(%arg0: i32, %arg1: memref<32x256xbf16, #tpu.memory_space<vmem>>, %arg2: memref<256x32xbf16, #tpu.memory_space<vmem>>, %arg3: memref<1x32xf32, #tpu.memory_space<vmem>>, %arg4: memref<32x32xbf16, #tpu.memory_space<vmem>>) attributes {dimension_semantics = [#tpu.dimension_semantics<parallel>], iteration_bounds = array<i64: 1>, scalar_prefetch = 0 : i64, scratch_operands = 0 : i64, tpu.core_type = #tpu.core_type<tc>, window_params = [{transform_indices = @transform_0, window_bounds = array<i64: 32, 256>}, {pipeline_mode = #tpu.pipeline_mode<synchronous>, transform_indices = @transform_1, window_bounds = array<i64: 256, 32>}, {pipeline_mode = #tpu.pipeline_mode<synchronous>, transform_indices = @transform_2, window_bounds = array<i64: 1, 32>}, {transform_indices = @transform_3, window_bounds = array<i64: 32, 32>}]} {
    %c0 = arith.constant 0 : index
    %c0_0 = arith.constant 0 : index
    %0 = vector.load %arg1[%c0, %c0_0] : memref<32x256xbf16, #tpu.memory_space<vmem>>, vector<32x256xbf16>
    %c0_1 = arith.constant 0 : index
    %c0_2 = arith.constant 0 : index
    %1 = vector.load %arg2[%c0_1, %c0_2] : memref<256x32xbf16, #tpu.memory_space<vmem>>, vector<256x32xbf16>
    %cst = arith.constant dense<0.000000e+00> : vector<32x32xf32>
    %2 = tpu.matmul %0, %1, %cst {dimension_numbers = #tpu.dot_dimension_numbers<[1], [0], [0], [1], [0, 0, 1, 1], [], []>} : vector<32x256xbf16>, vector<256x32xbf16>, vector<32x32xf32> -> vector<32x32xf32>
    %c0_3 = arith.constant 0 : index
    %c0_4 = arith.constant 0 : index
    %3 = vector.load %arg3[%c0_3, %c0_4] : memref<1x32xf32, #tpu.memory_space<vmem>>, vector<1x32xf32>
    %4 = vector.broadcast %3 : vector<1x32xf32> to vector<32x32xf32>
    %5 = arith.addf %2, %4 : vector<32x32xf32>
    %cst_5 = arith.constant 0.000000e+00 : f32
    %6 = vector.broadcast %cst_5 : f32 to vector<32x32xf32>
    %7 = arith.maximumf %5, %6 : vector<32x32xf32>
    %8 = arith.truncf %7 : vector<32x32xf32> to vector<32x32xbf16>
    %c0_6 = arith.constant 0 : index
    %c0_7 = arith.constant 0 : index
    %9 = vector.load %arg4[%c0_6, %c0_7] : memref<32x32xbf16, #tpu.memory_space<vmem>>, vector<32x32xbf16>
    tpu.vector_store %arg4[%c0_6, %c0_7], %8 {strides = array<i32>} : memref<32x32xbf16, #tpu.memory_space<vmem>>, vector<32x32xbf16>,
    return
  }
  func.func @transform_0(%arg0: i32) -> (i32, i32) {
    %c0_i32 = arith.constant 0 : i32
    %c0_i32_0 = arith.constant 0 : i32
    return %arg0, %c0_i32 : i32, i32
  }
  func.func @transform_1(%arg0: i32) -> (i32, i32) {
    %c0_i32 = arith.constant 0 : i32
    %c0_i32_0 = arith.constant 0 : i32
    %c0_i32_1 = arith.constant 0 : i32
    return %c0_i32, %c0_i32_0 : i32, i32
  }
  func.func @transform_2(%arg0: i32) -> (i32, i32) {
    %c0_i32 = arith.constant 0 : i32
    %c0_i32_0 = arith.constant 0 : i32
    %c0_i32_1 = arith.constant 0 : i32
    return %c0_i32, %c0_i32_0 : i32, i32
  }
  func.func @transform_3(%arg0: i32) -> (i32, i32) {
    %c0_i32 = arith.constant 0 : i32
    %c0_i32_0 = arith.constant 0 : i32
    return %arg0, %c0_i32 : i32, i32
  }
}

module attributes {stable_mosaic.version = 11 : i64} {
  func.func @_gemm_kernel(%arg0: i32, %arg1: memref<32x288xbf16, #tpu.memory_space<vmem>>, %arg2: memref<288x16xbf16, #tpu.memory_space<vmem>>, %arg3: memref<1x16xf32, #tpu.memory_space<vmem>>, %arg4: memref<32x16xbf16, #tpu.memory_space<vmem>>) attributes {dimension_semantics = [#tpu.dimension_semantics<parallel>], iteration_bounds = array<i64: 1>, scalar_prefetch = 0 : i64, scratch_operands = 0 : i64, tpu.core_type = #tpu.core_type<tc>, window_params = [{transform_indices = @transform_0, window_bounds = array<i64: 32, 288>}, {pipeline_mode = #tpu.pipeline_mode<synchronous>, transform_indices = @transform_1, window_bounds = array<i64: 288, 16>}, {pipeline_mode = #tpu.pipeline_mode<synchronous>, transform_indices = @transform_2, window_bounds = array<i64: 1, 16>}, {transform_indices = @transform_3, window_bounds = array<i64: 32, 16>}]} {
    %c0 = arith.constant 0 : index
    %c0_0 = arith.constant 0 : index
    %0 = vector.load %arg1[%c0, %c0_0] : memref<32x288xbf16, #tpu.memory_space<vmem>>, vector<32x288xbf16>
    %cst = arith.constant 0.000000e+00 : bf16
    %1 = vector.broadcast %cst : bf16 to vector<32x288xbf16>
    %2 = arith.maximumf %0, %1 : vector<32x288xbf16>
    %c0_1 = arith.constant 0 : index
    %c0_2 = arith.constant 0 : index
    %3 = vector.load %arg2[%c0_1, %c0_2] : memref<288x16xbf16, #tpu.memory_space<vmem>>, vector<288x16xbf16>
    %cst_3 = arith.constant dense<0.000000e+00> : vector<32x16xf32>
    %4 = tpu.matmul %2, %3, %cst_3 {dimension_numbers = #tpu.dot_dimension_numbers<[1], [0], [0], [1], [0, 0, 1, 1], [], []>} : vector<32x288xbf16>, vector<288x16xbf16>, vector<32x16xf32> -> vector<32x16xf32>
    %c0_4 = arith.constant 0 : index
    %c0_5 = arith.constant 0 : index
    %5 = vector.load %arg3[%c0_4, %c0_5] : memref<1x16xf32, #tpu.memory_space<vmem>>, vector<1x16xf32>
    %6 = vector.broadcast %5 : vector<1x16xf32> to vector<32x16xf32>
    %7 = arith.addf %4, %6 : vector<32x16xf32>
    %cst_6 = arith.constant 0.000000e+00 : f32
    %8 = vector.broadcast %cst_6 : f32 to vector<32x16xf32>
    %9 = arith.maximumf %7, %8 : vector<32x16xf32>
    %10 = arith.truncf %9 : vector<32x16xf32> to vector<32x16xbf16>
    %c0_7 = arith.constant 0 : index
    %c0_8 = arith.constant 0 : index
    %11 = vector.load %arg4[%c0_7, %c0_8] : memref<32x16xbf16, #tpu.memory_space<vmem>>, vector<32x16xbf16>
    tpu.vector_store %arg4[%c0_7, %c0_8], %10 {strides = array<i32>} : memref<32x16xbf16, #tpu.memory_space<vmem>>, vector<32x16xbf16>,
    return
  }
  func.func @transform_0(%arg0: i32) -> (i32, i32) {
    %c0_i32 = arith.constant 0 : i32
    %c0_i32_0 = arith.constant 0 : i32
    return %arg0, %c0_i32 : i32, i32
  }
  func.func @transform_1(%arg0: i32) -> (i32, i32) {
    %c0_i32 = arith.constant 0 : i32
    %c0_i32_0 = arith.constant 0 : i32
    %c0_i32_1 = arith.constant 0 : i32
    return %c0_i32, %c0_i32_0 : i32, i32
  }
  func.func @transform_2(%arg0: i32) -> (i32, i32) {
    %c0_i32 = arith.constant 0 : i32
    %c0_i32_0 = arith.constant 0 : i32
    %c0_i32_1 = arith.constant 0 : i32
    return %c0_i32, %c0_i32_0 : i32, i32
  }
  func.func @transform_3(%arg0: i32) -> (i32, i32) {
    %c0_i32 = arith.constant 0 : i32
    %c0_i32_0 = arith.constant 0 : i32
    return %arg0, %c0_i32 : i32, i32
  }
}

module attributes {stable_mosaic.version = 11 : i64} {
  func.func @_gemm_res_kernel(%arg0: i32, %arg1: memref<32x16xbf16, #tpu.memory_space<vmem>>, %arg2: memref<16x32xbf16, #tpu.memory_space<vmem>>, %arg3: memref<1x32xf32, #tpu.memory_space<vmem>>, %arg4: memref<32x32xbf16, #tpu.memory_space<vmem>>, %arg5: memref<32x32xbf16, #tpu.memory_space<vmem>>) attributes {dimension_semantics = [#tpu.dimension_semantics<parallel>], iteration_bounds = array<i64: 1>, scalar_prefetch = 0 : i64, scratch_operands = 0 : i64, tpu.core_type = #tpu.core_type<tc>, window_params = [{transform_indices = @transform_0, window_bounds = array<i64: 32, 16>}, {pipeline_mode = #tpu.pipeline_mode<synchronous>, transform_indices = @transform_1, window_bounds = array<i64: 16, 32>}, {pipeline_mode = #tpu.pipeline_mode<synchronous>, transform_indices = @transform_2, window_bounds = array<i64: 1, 32>}, {transform_indices = @transform_3, window_bounds = array<i64: 32, 32>}, {transform_indices = @transform_4, window_bounds = array<i64: 32, 32>}]} {
    %c0 = arith.constant 0 : index
    %c0_0 = arith.constant 0 : index
    %0 = vector.load %arg1[%c0, %c0_0] : memref<32x16xbf16, #tpu.memory_space<vmem>>, vector<32x16xbf16>
    %c0_1 = arith.constant 0 : index
    %c0_2 = arith.constant 0 : index
    %1 = vector.load %arg2[%c0_1, %c0_2] : memref<16x32xbf16, #tpu.memory_space<vmem>>, vector<16x32xbf16>
    %cst = arith.constant dense<0.000000e+00> : vector<32x32xf32>
    %2 = tpu.matmul %0, %1, %cst {dimension_numbers = #tpu.dot_dimension_numbers<[1], [0], [0], [1], [0, 0, 1, 1], [], []>} : vector<32x16xbf16>, vector<16x32xbf16>, vector<32x32xf32> -> vector<32x32xf32>
    %c0_3 = arith.constant 0 : index
    %c0_4 = arith.constant 0 : index
    %3 = vector.load %arg3[%c0_3, %c0_4] : memref<1x32xf32, #tpu.memory_space<vmem>>, vector<1x32xf32>
    %4 = vector.broadcast %3 : vector<1x32xf32> to vector<32x32xf32>
    %5 = arith.addf %2, %4 : vector<32x32xf32>
    %c0_5 = arith.constant 0 : index
    %c0_6 = arith.constant 0 : index
    %6 = vector.load %arg4[%c0_5, %c0_6] : memref<32x32xbf16, #tpu.memory_space<vmem>>, vector<32x32xbf16>
    %7 = arith.extf %6 : vector<32x32xbf16> to vector<32x32xf32>
    %8 = arith.addf %5, %7 : vector<32x32xf32>
    %9 = arith.truncf %8 : vector<32x32xf32> to vector<32x32xbf16>
    %c0_7 = arith.constant 0 : index
    %c0_8 = arith.constant 0 : index
    %10 = vector.load %arg5[%c0_7, %c0_8] : memref<32x32xbf16, #tpu.memory_space<vmem>>, vector<32x32xbf16>
    tpu.vector_store %arg5[%c0_7, %c0_8], %9 {strides = array<i32>} : memref<32x32xbf16, #tpu.memory_space<vmem>>, vector<32x32xbf16>,
    return
  }
  func.func @transform_0(%arg0: i32) -> (i32, i32) {
    %c0_i32 = arith.constant 0 : i32
    %c0_i32_0 = arith.constant 0 : i32
    return %arg0, %c0_i32 : i32, i32
  }
  func.func @transform_1(%arg0: i32) -> (i32, i32) {
    %c0_i32 = arith.constant 0 : i32
    %c0_i32_0 = arith.constant 0 : i32
    %c0_i32_1 = arith.constant 0 : i32
    return %c0_i32, %c0_i32_0 : i32, i32
  }
  func.func @transform_2(%arg0: i32) -> (i32, i32) {
    %c0_i32 = arith.constant 0 : i32
    %c0_i32_0 = arith.constant 0 : i32
    %c0_i32_1 = arith.constant 0 : i32
    return %c0_i32, %c0_i32_0 : i32, i32
  }
  func.func @transform_3(%arg0: i32) -> (i32, i32) {
    %c0_i32 = arith.constant 0 : i32
    %c0_i32_0 = arith.constant 0 : i32
    return %arg0, %c0_i32 : i32, i32
  }
  func.func @transform_4(%arg0: i32) -> (i32, i32) {
    %c0_i32 = arith.constant 0 : i32
    %c0_i32_0 = arith.constant 0 : i32
    return %arg0, %c0_i32 : i32, i32
  }
}

module attributes {stable_mosaic.version = 11 : i64} {
  func.func @_vq_fused_kernel(%arg0: i32, %arg1: memref<32x32xbf16, #tpu.memory_space<vmem>>, %arg2: memref<32x8xbf16, #tpu.memory_space<vmem>>, %arg3: memref<1x8xf32, #tpu.memory_space<vmem>>, %arg4: memref<16x8xf32, #tpu.memory_space<vmem>>, %arg5: memref<1x16xf32, #tpu.memory_space<vmem>>, %arg6: memref<8x32xbf16, #tpu.memory_space<vmem>>, %arg7: memref<1x32xf32, #tpu.memory_space<vmem>>, %arg8: memref<32x8xf32, #tpu.memory_space<vmem>>, %arg9: memref<32x32xbf16, #tpu.memory_space<vmem>>, %arg10: memref<32x1xi32, #tpu.memory_space<vmem>>, %arg11: memref<8x128xf32, #tpu.memory_space<vmem>>) attributes {dimension_semantics = [#tpu.dimension_semantics<parallel>], iteration_bounds = array<i64: 1>, scalar_prefetch = 0 : i64, scratch_operands = 0 : i64, tpu.core_type = #tpu.core_type<tc>, window_params = [{transform_indices = @transform_0, window_bounds = array<i64: 32, 32>}, {pipeline_mode = #tpu.pipeline_mode<synchronous>, transform_indices = @transform_1, window_bounds = array<i64: 32, 8>}, {pipeline_mode = #tpu.pipeline_mode<synchronous>, transform_indices = @transform_2, window_bounds = array<i64: 1, 8>}, {pipeline_mode = #tpu.pipeline_mode<synchronous>, transform_indices = @transform_3, window_bounds = array<i64: 16, 8>}, {pipeline_mode = #tpu.pipeline_mode<synchronous>, transform_indices = @transform_4, window_bounds = array<i64: 1, 16>}, {pipeline_mode = #tpu.pipeline_mode<synchronous>, transform_indices = @transform_5, window_bounds = array<i64: 8, 32>}, {pipeline_mode = #tpu.pipeline_mode<synchronous>, transform_indices = @transform_6, window_bounds = array<i64: 1, 32>}, {transform_indices = @transform_7, window_bounds = array<i64: 32, 8>}, {transform_indices = @transform_8, window_bounds = array<i64: 32, 32>}, {transform_indices = @transform_9, window_bounds = array<i64: 32, 1>}, {transform_indices = @transform_10, window_bounds = array<i64: 8, 128>}]} {
    %c0 = arith.constant 0 : index
    %c0_0 = arith.constant 0 : index
    %0 = vector.load %arg1[%c0, %c0_0] : memref<32x32xbf16, #tpu.memory_space<vmem>>, vector<32x32xbf16>
    %cst = arith.constant 0.000000e+00 : bf16
    %1 = vector.broadcast %cst : bf16 to vector<32x32xbf16>
    %2 = arith.maximumf %0, %1 : vector<32x32xbf16>
    %c0_1 = arith.constant 0 : index
    %c0_2 = arith.constant 0 : index
    %3 = vector.load %arg2[%c0_1, %c0_2] : memref<32x8xbf16, #tpu.memory_space<vmem>>, vector<32x8xbf16>
    %cst_3 = arith.constant dense<0.000000e+00> : vector<32x8xf32>
    %4 = tpu.matmul %2, %3, %cst_3 {dimension_numbers = #tpu.dot_dimension_numbers<[1], [0], [0], [1], [0, 0, 1, 1], [], []>} : vector<32x32xbf16>, vector<32x8xbf16>, vector<32x8xf32> -> vector<32x8xf32>
    %c0_4 = arith.constant 0 : index
    %c0_5 = arith.constant 0 : index
    %5 = vector.load %arg3[%c0_4, %c0_5] : memref<1x8xf32, #tpu.memory_space<vmem>>, vector<1x8xf32>
    %6 = vector.broadcast %5 : vector<1x8xf32> to vector<32x8xf32>
    %7 = arith.addf %4, %6 : vector<32x8xf32>
    %c0_6 = arith.constant 0 : index
    %c0_7 = arith.constant 0 : index
    %8 = vector.load %arg4[%c0_6, %c0_7] : memref<16x8xf32, #tpu.memory_space<vmem>>, vector<16x8xf32>
    %9 = arith.truncf %7 : vector<32x8xf32> to vector<32x8xbf16>
    %10 = arith.truncf %8 : vector<16x8xf32> to vector<16x8xbf16>
    %cst_8 = arith.constant dense<0.000000e+00> : vector<32x16xf32>
    %11 = tpu.matmul %9, %10, %cst_8 {dimension_numbers = #tpu.dot_dimension_numbers<[1], [1], [0], [0], [0, 0, 1, 0], [], []>} : vector<32x8xbf16>, vector<16x8xbf16>, vector<32x16xf32> -> vector<32x16xf32>
    %c0_9 = arith.constant 0 : index
    %c0_10 = arith.constant 0 : index
    %12 = vector.load %arg5[%c0_9, %c0_10] : memref<1x16xf32, #tpu.memory_space<vmem>>, vector<1x16xf32>
    %cst_11 = arith.constant 2.000000e+00 : f32
    %13 = vector.broadcast %cst_11 : f32 to vector<32x16xf32>
    %14 = arith.mulf %13, %11 : vector<32x16xf32>
    %15 = vector.broadcast %12 : vector<1x16xf32> to vector<32x16xf32>
    %16 = arith.subf %15, %14 : vector<32x16xf32>
    %17 = tpu.iota {dimensions = array<i32: 1>} : vector<32x16xi32>
    %cst_12 = arith.constant dense<0x7F800000> : vector<32xf32>
    %18 = vector.multi_reduction <minimumf>, %16, %cst_12 [1] : vector<32x16xf32> to vector<32xf32>
    %19 = vector.shape_cast %18 : vector<32xf32> to vector<32x1xf32>
    %20 = vector.broadcast %19 : vector<32x1xf32> to vector<32x16xf32>
    %21 = arith.cmpf oeq, %16, %20 : vector<32x16xf32>
    %c16_i32 = arith.constant 16 : i32
    %22 = vector.broadcast %c16_i32 : i32 to vector<32x16xi32>
    %23 = arith.select %21, %17, %22 : vector<32x16xi1>, vector<32x16xi32>
    %cst_13 = arith.constant dense<2147483647> : vector<32xi32>
    %24 = vector.multi_reduction <minsi>, %23, %cst_13 [1] : vector<32x16xi32> to vector<32xi32>
    %25 = vector.shape_cast %24 : vector<32xi32> to vector<32x1xi32>
    %26 = vector.broadcast %25 : vector<32x1xi32> to vector<32x16xi32>
    %27 = arith.cmpi eq, %17, %26 : vector<32x16xi32>
    %28 = arith.extui %27 : vector<32x16xi1> to vector<32x16xi32>
    %29 = arith.sitofp %28 : vector<32x16xi32> to vector<32x16xf32>
    %cst_14 = arith.constant dense<0.000000e+00> : vector<32x8xf32>
    %30 = tpu.matmul %29, %8, %cst_14 {dimension_numbers = #tpu.dot_dimension_numbers<[1], [0], [0], [1], [0, 0, 1, 1], [], []>} : vector<32x16xf32>, vector<16x8xf32>, vector<32x8xf32> -> vector<32x8xf32>
    %c0_15 = arith.constant 0 : index
    %c0_16 = arith.constant 0 : index
    %31 = vector.load %arg8[%c0_15, %c0_16] : memref<32x8xf32, #tpu.memory_space<vmem>>, vector<32x8xf32>
    tpu.vector_store %arg8[%c0_15, %c0_16], %30 {strides = array<i32>} : memref<32x8xf32, #tpu.memory_space<vmem>>, vector<32x8xf32>,
    %c0_17 = arith.constant 0 : index
    %c0_18 = arith.constant 0 : index
    %32 = vector.load %arg10[%c0_17, %c0_18] : memref<32x1xi32, #tpu.memory_space<vmem>>, vector<32x1xi32>
    tpu.vector_store %arg10[%c0_17, %c0_18], %25 {strides = array<i32>} : memref<32x1xi32, #tpu.memory_space<vmem>>, vector<32x1xi32>,
    %33 = arith.truncf %30 : vector<32x8xf32> to vector<32x8xbf16>
    %c0_19 = arith.constant 0 : index
    %c0_20 = arith.constant 0 : index
    %34 = vector.load %arg6[%c0_19, %c0_20] : memref<8x32xbf16, #tpu.memory_space<vmem>>, vector<8x32xbf16>
    %cst_21 = arith.constant dense<0.000000e+00> : vector<32x32xf32>
    %35 = tpu.matmul %33, %34, %cst_21 {dimension_numbers = #tpu.dot_dimension_numbers<[1], [0], [0], [1], [0, 0, 1, 1], [], []>} : vector<32x8xbf16>, vector<8x32xbf16>, vector<32x32xf32> -> vector<32x32xf32>
    %c0_22 = arith.constant 0 : index
    %c0_23 = arith.constant 0 : index
    %36 = vector.load %arg7[%c0_22, %c0_23] : memref<1x32xf32, #tpu.memory_space<vmem>>, vector<1x32xf32>
    %37 = vector.broadcast %36 : vector<1x32xf32> to vector<32x32xf32>
    %38 = arith.addf %35, %37 : vector<32x32xf32>
    %39 = arith.truncf %38 : vector<32x32xf32> to vector<32x32xbf16>
    %c0_24 = arith.constant 0 : index
    %c0_25 = arith.constant 0 : index
    %40 = vector.load %arg9[%c0_24, %c0_25] : memref<32x32xbf16, #tpu.memory_space<vmem>>, vector<32x32xbf16>
    tpu.vector_store %arg9[%c0_24, %c0_25], %39 {strides = array<i32>} : memref<32x32xbf16, #tpu.memory_space<vmem>>, vector<32x32xbf16>,
    %41 = tpu.iota {dimensions = array<i32: 0>} : vector<32x1xi32>
    %c32_i32 = arith.constant 32 : i32
    %42 = arith.muli %arg0, %c32_i32 : i32
    %43 = vector.broadcast %42 : i32 to vector<32x1xi32>
    %44 = arith.addi %41, %43 : vector<32x1xi32>
    %45 = arith.subf %30, %7 : vector<32x8xf32>
    %c32_i32_26 = arith.constant 32 : i32
    %46 = vector.broadcast %c32_i32_26 : i32 to vector<32x1xi32>
    %47 = arith.cmpi slt, %44, %46 : vector<32x1xi32>
    %48 = arith.extui %47 : vector<32x1xi1> to vector<32x1xi32>
    %49 = arith.sitofp %48 : vector<32x1xi32> to vector<32x1xf32>
    %50 = vector.broadcast %49 : vector<32x1xf32> to vector<32x8xf32>
    %51 = arith.mulf %45, %50 : vector<32x8xf32>
    %52 = arith.mulf %51, %51 : vector<32x8xf32>
    %53 = vector.shape_cast %52 : vector<32x8xf32> to vector<1x32x8xf32>
    %cst_27 = arith.constant dense<0.000000e+00> : vector<1xf32>
    %54 = vector.multi_reduction <add>, %53, %cst_27 [1, 2] : vector<1x32x8xf32> to vector<1xf32>
    %55 = vector.shape_cast %54 : vector<1xf32> to vector<1x1x1xf32>
    %56 = vector.extract %55[0, 0, 0] : f32 from vector<1x1x1xf32>
    %57 = vector.broadcast %56 : f32 to vector<1x1xf32>
    %58 = tpu.iota {dimensions = array<i32: 0>} : vector<8x128xi32>
    %59 = tpu.iota {dimensions = array<i32: 1>} : vector<8x128xi32>
    %c0_i32 = arith.constant 0 : i32
    %60 = vector.broadcast %c0_i32 : i32 to vector<8x128xi32>
    %61 = arith.cmpi eq, %58, %60 : vector<8x128xi32>
    %c0_i32_28 = arith.constant 0 : i32
    %62 = vector.broadcast %c0_i32_28 : i32 to vector<8x128xi32>
    %63 = arith.cmpi eq, %59, %62 : vector<8x128xi32>
    %64 = arith.andi %61, %63 : vector<8x128xi1>
    %cst_29 = arith.constant 0.000000e+00 : f32
    %65 = vector.shape_cast %57 : vector<1x1xf32> to vector<1x1xf32>
    %66 = vector.broadcast %65 : vector<1x1xf32> to vector<8x128xf32>
    %67 = vector.broadcast %cst_29 : f32 to vector<8x128xf32>
    %68 = arith.select %64, %66, %67 : vector<8x128xi1>, vector<8x128xf32>
    %c0_30 = arith.constant 0 : index
    %c0_31 = arith.constant 0 : index
    %69 = vector.load %arg11[%c0_30, %c0_31] : memref<8x128xf32, #tpu.memory_space<vmem>>, vector<8x128xf32>
    tpu.vector_store %arg11[%c0_30, %c0_31], %68 {strides = array<i32>} : memref<8x128xf32, #tpu.memory_space<vmem>>, vector<8x128xf32>,
    return
  }
  func.func @transform_0(%arg0: i32) -> (i32, i32) {
    %c0_i32 = arith.constant 0 : i32
    %c0_i32_0 = arith.constant 0 : i32
    return %arg0, %c0_i32 : i32, i32
  }
  func.func @transform_1(%arg0: i32) -> (i32, i32) {
    %c0_i32 = arith.constant 0 : i32
    %c0_i32_0 = arith.constant 0 : i32
    %c0_i32_1 = arith.constant 0 : i32
    return %c0_i32, %c0_i32_0 : i32, i32
  }
  func.func @transform_2(%arg0: i32) -> (i32, i32) {
    %c0_i32 = arith.constant 0 : i32
    %c0_i32_0 = arith.constant 0 : i32
    %c0_i32_1 = arith.constant 0 : i32
    return %c0_i32, %c0_i32_0 : i32, i32
  }
  func.func @transform_3(%arg0: i32) -> (i32, i32) {
    %c0_i32 = arith.constant 0 : i32
    %c0_i32_0 = arith.constant 0 : i32
    %c0_i32_1 = arith.constant 0 : i32
    return %c0_i32, %c0_i32_0 : i32, i32
  }
  func.func @transform_4(%arg0: i32) -> (i32, i32) {
    %c0_i32 = arith.constant 0 : i32
    %c0_i32_0 = arith.constant 0 : i32
    %c0_i32_1 = arith.constant 0 : i32
    return %c0_i32, %c0_i32_0 : i32, i32
  }
  func.func @transform_5(%arg0: i32) -> (i32, i32) {
    %c0_i32 = arith.constant 0 : i32
    %c0_i32_0 = arith.constant 0 : i32
    %c0_i32_1 = arith.constant 0 : i32
    return %c0_i32, %c0_i32_0 : i32, i32
  }
  func.func @transform_6(%arg0: i32) -> (i32, i32) {
    %c0_i32 = arith.constant 0 : i32
    %c0_i32_0 = arith.constant 0 : i32
    %c0_i32_1 = arith.constant 0 : i32
    return %c0_i32, %c0_i32_0 : i32, i32
  }
  func.func @transform_7(%arg0: i32) -> (i32, i32) {
    %c0_i32 = arith.constant 0 : i32
    %c0_i32_0 = arith.constant 0 : i32
    return %arg0, %c0_i32 : i32, i32
  }
  func.func @transform_8(%arg0: i32) -> (i32, i32) {
    %c0_i32 = arith.constant 0 : i32
    %c0_i32_0 = arith.constant 0 : i32
    return %arg0, %c0_i32 : i32, i32
  }
  func.func @transform_9(%arg0: i32) -> (i32, i32) {
    %c0_i32 = arith.constant 0 : i32
    %c0_i32_0 = arith.constant 0 : i32
    return %arg0, %c0_i32 : i32, i32
  }
  func.func @transform_10(%arg0: i32) -> (i32, i32) {
    %c0_i32 = arith.constant 0 : i32
    %c0_i32_0 = arith.constant 0 : i32
    return %arg0, %c0_i32 : i32, i32
  }
}

module attributes {stable_mosaic.version = 11 : i64} {
  func.func @_gemm_kernel(%arg0: i32, %arg1: memref<32x288xbf16, #tpu.memory_space<vmem>>, %arg2: memref<288x64xbf16, #tpu.memory_space<vmem>>, %arg3: memref<1x64xf32, #tpu.memory_space<vmem>>, %arg4: memref<32x64xbf16, #tpu.memory_space<vmem>>) attributes {dimension_semantics = [#tpu.dimension_semantics<parallel>], iteration_bounds = array<i64: 1>, scalar_prefetch = 0 : i64, scratch_operands = 0 : i64, tpu.core_type = #tpu.core_type<tc>, window_params = [{transform_indices = @transform_0, window_bounds = array<i64: 32, 288>}, {pipeline_mode = #tpu.pipeline_mode<synchronous>, transform_indices = @transform_1, window_bounds = array<i64: 288, 64>}, {pipeline_mode = #tpu.pipeline_mode<synchronous>, transform_indices = @transform_2, window_bounds = array<i64: 1, 64>}, {transform_indices = @transform_3, window_bounds = array<i64: 32, 64>}]} {
    %c0 = arith.constant 0 : index
    %c0_0 = arith.constant 0 : index
    %0 = vector.load %arg1[%c0, %c0_0] : memref<32x288xbf16, #tpu.memory_space<vmem>>, vector<32x288xbf16>
    %cst = arith.constant 0.000000e+00 : bf16
    %1 = vector.broadcast %cst : bf16 to vector<32x288xbf16>
    %2 = arith.maximumf %0, %1 : vector<32x288xbf16>
    %c0_1 = arith.constant 0 : index
    %c0_2 = arith.constant 0 : index
    %3 = vector.load %arg2[%c0_1, %c0_2] : memref<288x64xbf16, #tpu.memory_space<vmem>>, vector<288x64xbf16>
    %cst_3 = arith.constant dense<0.000000e+00> : vector<32x64xf32>
    %4 = tpu.matmul %2, %3, %cst_3 {dimension_numbers = #tpu.dot_dimension_numbers<[1], [0], [0], [1], [0, 0, 1, 1], [], []>} : vector<32x288xbf16>, vector<288x64xbf16>, vector<32x64xf32> -> vector<32x64xf32>
    %c0_4 = arith.constant 0 : index
    %c0_5 = arith.constant 0 : index
    %5 = vector.load %arg3[%c0_4, %c0_5] : memref<1x64xf32, #tpu.memory_space<vmem>>, vector<1x64xf32>
    %6 = vector.broadcast %5 : vector<1x64xf32> to vector<32x64xf32>
    %7 = arith.addf %4, %6 : vector<32x64xf32>
    %cst_6 = arith.constant 0.000000e+00 : f32
    %8 = vector.broadcast %cst_6 : f32 to vector<32x64xf32>
    %9 = arith.maximumf %7, %8 : vector<32x64xf32>
    %10 = arith.truncf %9 : vector<32x64xf32> to vector<32x64xbf16>
    %c0_7 = arith.constant 0 : index
    %c0_8 = arith.constant 0 : index
    %11 = vector.load %arg4[%c0_7, %c0_8] : memref<32x64xbf16, #tpu.memory_space<vmem>>, vector<32x64xbf16>
    tpu.vector_store %arg4[%c0_7, %c0_8], %10 {strides = array<i32>} : memref<32x64xbf16, #tpu.memory_space<vmem>>, vector<32x64xbf16>,
    return
  }
  func.func @transform_0(%arg0: i32) -> (i32, i32) {
    %c0_i32 = arith.constant 0 : i32
    %c0_i32_0 = arith.constant 0 : i32
    return %arg0, %c0_i32 : i32, i32
  }
  func.func @transform_1(%arg0: i32) -> (i32, i32) {
    %c0_i32 = arith.constant 0 : i32
    %c0_i32_0 = arith.constant 0 : i32
    %c0_i32_1 = arith.constant 0 : i32
    return %c0_i32, %c0_i32_0 : i32, i32
  }
  func.func @transform_2(%arg0: i32) -> (i32, i32) {
    %c0_i32 = arith.constant 0 : i32
    %c0_i32_0 = arith.constant 0 : i32
    %c0_i32_1 = arith.constant 0 : i32
    return %c0_i32, %c0_i32_0 : i32, i32
  }
  func.func @transform_3(%arg0: i32) -> (i32, i32) {
    %c0_i32 = arith.constant 0 : i32
    %c0_i32_0 = arith.constant 0 : i32
    return %arg0, %c0_i32 : i32, i32
  }
}

module attributes {stable_mosaic.version = 11 : i64} {
  func.func @_gemm_kernel(%arg0: i32, %arg1: memref<128x144xbf16, #tpu.memory_space<vmem>>, %arg2: memref<144x12xbf16, #tpu.memory_space<vmem>>, %arg3: memref<1x12xf32, #tpu.memory_space<vmem>>, %arg4: memref<128x12xf32, #tpu.memory_space<vmem>>) attributes {dimension_semantics = [#tpu.dimension_semantics<parallel>], iteration_bounds = array<i64: 1>, scalar_prefetch = 0 : i64, scratch_operands = 0 : i64, tpu.core_type = #tpu.core_type<tc>, window_params = [{transform_indices = @transform_0, window_bounds = array<i64: 128, 144>}, {pipeline_mode = #tpu.pipeline_mode<synchronous>, transform_indices = @transform_1, window_bounds = array<i64: 144, 12>}, {pipeline_mode = #tpu.pipeline_mode<synchronous>, transform_indices = @transform_2, window_bounds = array<i64: 1, 12>}, {transform_indices = @transform_3, window_bounds = array<i64: 128, 12>}]} {
    %c0 = arith.constant 0 : index
    %c0_0 = arith.constant 0 : index
    %0 = vector.load %arg1[%c0, %c0_0] : memref<128x144xbf16, #tpu.memory_space<vmem>>, vector<128x144xbf16>
    %c0_1 = arith.constant 0 : index
    %c0_2 = arith.constant 0 : index
    %1 = vector.load %arg2[%c0_1, %c0_2] : memref<144x12xbf16, #tpu.memory_space<vmem>>, vector<144x12xbf16>
    %cst = arith.constant dense<0.000000e+00> : vector<128x12xf32>
    %2 = tpu.matmul %0, %1, %cst {dimension_numbers = #tpu.dot_dimension_numbers<[1], [0], [0], [1], [0, 0, 1, 1], [], []>} : vector<128x144xbf16>, vector<144x12xbf16>, vector<128x12xf32> -> vector<128x12xf32>
    %c0_3 = arith.constant 0 : index
    %c0_4 = arith.constant 0 : index
    %3 = vector.load %arg3[%c0_3, %c0_4] : memref<1x12xf32, #tpu.memory_space<vmem>>, vector<1x12xf32>
    %4 = vector.broadcast %3 : vector<1x12xf32> to vector<128x12xf32>
    %5 = arith.addf %2, %4 : vector<128x12xf32>
    %c0_5 = arith.constant 0 : index
    %c0_6 = arith.constant 0 : index
    %6 = vector.load %arg4[%c0_5, %c0_6] : memref<128x12xf32, #tpu.memory_space<vmem>>, vector<128x12xf32>
    tpu.vector_store %arg4[%c0_5, %c0_6], %5 {strides = array<i32>} : memref<128x12xf32, #tpu.memory_space<vmem>>, vector<128x12xf32>,
    return
  }
  func.func @transform_0(%arg0: i32) -> (i32, i32) {
    %c0_i32 = arith.constant 0 : i32
    %c0_i32_0 = arith.constant 0 : i32
    return %arg0, %c0_i32 : i32, i32
  }
  func.func @transform_1(%arg0: i32) -> (i32, i32) {
    %c0_i32 = arith.constant 0 : i32
    %c0_i32_0 = arith.constant 0 : i32
    %c0_i32_1 = arith.constant 0 : i32
    return %c0_i32, %c0_i32_0 : i32, i32
  }
  func.func @transform_2(%arg0: i32) -> (i32, i32) {
    %c0_i32 = arith.constant 0 : i32
    %c0_i32_0 = arith.constant 0 : i32
    %c0_i32_1 = arith.constant 0 : i32
    return %c0_i32, %c0_i32_0 : i32, i32
  }
  func.func @transform_3(%arg0: i32) -> (i32, i32) {
    %c0_i32 = arith.constant 0 : i32
    %c0_i32_0 = arith.constant 0 : i32
    return %arg0, %c0_i32 : i32, i32
  }
}

</mosaic_0001>

<bundles_post_ra>
// kernel: resnet_vqvae_forward.15
= control target key start
LH: loop header
LB: loop body
LE: loop exit
PB: predicated region body
PF: predicated region fallthrough
CT: control target
= control target key end

     0   :  { %vm99_vm0 = vcmask 392192   ;;  %vm205_vm1 = vcmask 125952   ;;  %s445_s1 = inlined_call_operand.vmem [shape: bf16[48,16], index: 1, kind: input, shape index: {}]   ;;  %s446_s2 = inlined_call_operand.vmem [shape: f32[1,16], index: 2, kind: input, shape index: {}]   ;;  %s447_s0 = inlined_call_operand.vmem [shape: bf16[128,48], index: 0, kind: input, shape index: {}]   ;;  %s448_s3 = inlined_call_operand.vmem [shape: bf16[128,16], index: 3, kind: output, shape index: {}]  }
   0x1   :  { %v288_v0 = vld [vmem:[%s445_s1 + $0x10] sm:$0xff]  ;;  %v287_v1 = vld [vmem:[%s445_s1 + $0x8] sm:$0xff]  ;;  %v286_v2 = vld [vmem:[%s445_s1] sm:$0xff] }
   0x2   :  { %129 = vmatpush.bf16.msra.mxu0 %v288_v0  ;;  %289 = vmatpush.bf16.msra.mxu1 %v288_v0  ;;  %v278_v3 = vld [vmem:[%s447_s0] sm:$0xff]  ;;  %v280_v4 = vld [vmem:[%s447_s0 + $0x10] sm:$0xff]  ;;  %v279_v7 = vld [vmem:[%s447_s0 + $0x8] sm:$0xff] }
   0x3   :  { %290 = vmatpush.bf16.msra.mxu2 %v288_v0  ;;  %291 = vmatpush.bf16.msra.mxu3 %v288_v0  ;;  %v282_v5 = vld [vmem:[%s447_s0 + $0x20] sm:$0xff]  ;;  %v284_v6 = vld [vmem:[%s447_s0 + $0x30] sm:$0xff]  ;;  %v281_v8 = vld [vmem:[%s447_s0 + $0x18] sm:$0xff] }
   0x4   :  { %v283_v9 = vld [vmem:[%s447_s0 + $0x28] sm:$0xff]  ;;  %v285_v10 = vld [vmem:[%s447_s0 + $0x38] sm:$0xff]  ;;  %v363_v11 = vld [vmem:[%s446_s2] ss:$0 sm:$0xff] }
   0x6   :  { %130 = vmatpush.bf16.msra.mxu0 %v287_v1  ;;  %292 = vmatpush.bf16.msra.mxu1 %v287_v1 }
   0x7   :  { %293 = vmatpush.bf16.msra.mxu2 %v287_v1  ;;  %294 = vmatpush.bf16.msra.mxu3 %v287_v1 }
   0xa   :  { %131 = vmatpush.bf16.msra.mxu0 %v286_v2  ;;  %295 = vmatpush.bf16.msra.mxu1 %v286_v2 }
   0xb   :  { %296 = vmatpush.bf16.msra.mxu2 %v286_v2  ;;  %297 = vmatpush.bf16.msra.mxu3 %v286_v2 }
   0xd   :  { %270 = vmatmul.msk.bf16.vlgmr.msra.gmra.mxu0 %vm99_vm0, %v278_v3  ;;  %272 = vmatmul.msk.bf16.vlgmr.msra.gmra.mxu1 %vm99_vm0, %v280_v4 }
   0xe   :  { %274 = vmatmul.msk.bf16.vlgmr.msra.gmra.mxu2 %vm99_vm0, %v282_v5  ;;  %276 = vmatmul.msk.bf16.vlgmr.msra.gmra.mxu3 %vm99_vm0, %v284_v6 }
  0x1d   :  { %271 = vmatmul.msk.bf16.gmra.mxu0 %vm99_vm0, %v279_v7  ;;  %273 = vmatmul.msk.bf16.gmra.mxu1 %vm99_vm0, %v281_v8 }
  0x1e   :  { %275 = vmatmul.msk.bf16.gmra.mxu2 %vm99_vm0, %v283_v9  ;;  %277 = vmatmul.msk.bf16.gmra.mxu3 %vm99_vm0, %v285_v10 }
  0x8a   :  { %v133_v12 = vpop.f32.mrf.mxu0  ;;  %v143_v13 = vpop.f32.mrf.mxu1 }
  0x8b   :  { %v134_v14 = vadd.f32 %v363_v11, %v133_v12  ;;  %v144_v15 = vadd.f32 %v363_v11, %v143_v13 }
  0x8d   :  { %v173_v16 = vmax.f32 %v134_v14, 0.0  ;;  %v177_v17 = vmax.f32 %v144_v15, 0.0 }
  0x8f   :  { %v189_v18 = vpack.c.bf16 %v173_v16, %v173_v16  ;;  %v193_v19 = vpack.c.bf16 %v177_v17, %v177_v17 }
  0x91   :  { %206 = vst.msk [vmem:[%s448_s3] sm:$0xf] %vm205_vm1, %v189_v18  ;;  %v153_v20 = vpop.f32.mrf.mxu2  ;;  %v163_v21 = vpop.f32.mrf.mxu3 }
  0x92   :  { %210 = vst.msk [vmem:[%s448_s3 + $0x10] sm:$0xf] %vm205_vm1, %v193_v19  ;;  %v154_v22 = vadd.f32 %v363_v11, %v153_v20  ;;  %v164_v23 = vadd.f32 %v363_v11, %v163_v21  ;;  %v135_v24 = vpop.f32.mrf.mxu0  ;;  %v145_v25 = vpop.f32.mrf.mxu1 }
  0x93   :  { %v136_v26 = vadd.f32 %v363_v11, %v135_v24  ;;  %v146_v27 = vadd.f32 %v363_v11, %v145_v25 }
  0x94   :  { %v181_v28 = vmax.f32 %v154_v22, 0.0  ;;  %v185_v29 = vmax.f32 %v164_v23, 0.0 }
  0x95   :  { %v174_v30 = vmax.f32 %v136_v26, 0.0  ;;  %v178_v31 = vmax.f32 %v146_v27, 0.0 }
  0x96   :  { %v197_v32 = vpack.c.bf16 %v181_v28, %v181_v28  ;;  %v201_v33 = vpack.c.bf16 %v185_v29, %v185_v29 }
  0x97   :  { %v190_v34 = vpack.c.bf16 %v174_v30, %v174_v30  ;;  %v194_v35 = vpack.c.bf16 %v178_v31, %v178_v31 }
  0x98   :  { %214 = vst.msk [vmem:[%s448_s3 + $0x20] sm:$0xf] %vm205_vm1, %v197_v32 }
  0x99   :  { %218 = vst.msk [vmem:[%s448_s3 + $0x30] sm:$0xf] %vm205_vm1, %v201_v33  ;;  %v155_v36 = vpop.f32.mrf.mxu2  ;;  %v165_v37 = vpop.f32.mrf.mxu3 }
  0x9a   :  { %207 = vst.msk [vmem:[%s448_s3 + $0x4] sm:$0xf] %vm205_vm1, %v190_v34  ;;  %v156_v38 = vadd.f32 %v363_v11, %v155_v36  ;;  %v166_v39 = vadd.f32 %v363_v11, %v165_v37  ;;  %v138_v40 = vpop.f32.mrf.mxu0  ;;  %v148_v41 = vpop.f32.mrf.mxu1 }
  0x9b   :  { %211 = vst.msk [vmem:[%s448_s3 + $0x14] sm:$0xf] %vm205_vm1, %v194_v35  ;;  %v139_v42 = vadd.f32 %v363_v11, %v138_v40  ;;  %v149_v43 = vadd.f32 %v363_v11, %v148_v41 }
  0x9c   :  { %v182_v44 = vmax.f32 %v156_v38, 0.0  ;;  %v186_v45 = vmax.f32 %v166_v39, 0.0 }
  0x9d   :  { %v175_v46 = vmax.f32 %v139_v42, 0.0  ;;  %v179_v47 = vmax.f32 %v149_v43, 0.0 }
  0x9e   :  { %v198_v48 = vpack.c.bf16 %v182_v44, %v182_v44  ;;  %v202_v49 = vpack.c.bf16 %v186_v45, %v186_v45 }
  0x9f   :  { %v191_v50 = vpack.c.bf16 %v175_v46, %v175_v46  ;;  %v195_v51 = vpack.c.bf16 %v179_v47, %v179_v47 }
  0xa0   :  { %215 = vst.msk [vmem:[%s448_s3 + $0x24] sm:$0xf] %vm205_vm1, %v198_v48 }
  0xa1   :  { %219 = vst.msk [vmem:[%s448_s3 + $0x34] sm:$0xf] %vm205_vm1, %v202_v49  ;;  %v158_v52 = vpop.f32.mrf.mxu2  ;;  %v168_v53 = vpop.f32.mrf.mxu3 }
  0xa2   :  { %208 = vst.msk [vmem:[%s448_s3 + $0x8] sm:$0xf] %vm205_vm1, %v191_v50  ;;  %v159_v54 = vadd.f32 %v363_v11, %v158_v52  ;;  %v169_v55 = vadd.f32 %v363_v11, %v168_v53  ;;  %v140_v56 = vpop.f32.mrf.mxu0  ;;  %v150_v57 = vpop.f32.mrf.mxu1 }
  0xa3   :  { %212 = vst.msk [vmem:[%s448_s3 + $0x18] sm:$0xf] %vm205_vm1, %v195_v51  ;;  %v141_v58 = vadd.f32 %v363_v11, %v140_v56  ;;  %v151_v59 = vadd.f32 %v363_v11, %v150_v57 }
  0xa4   :  { %v183_v60 = vmax.f32 %v159_v54, 0.0  ;;  %v187_v61 = vmax.f32 %v169_v55, 0.0 }
  0xa5   :  { %v176_v62 = vmax.f32 %v141_v58, 0.0  ;;  %v180_v63 = vmax.f32 %v151_v59, 0.0 }
  0xa6   :  { %v199_v0 = vpack.c.bf16 %v183_v60, %v183_v60  ;;  %v203_v1 = vpack.c.bf16 %v187_v61, %v187_v61 }
  0xa7   :  { %v192_v2 = vpack.c.bf16 %v176_v62, %v176_v62  ;;  %v196_v3 = vpack.c.bf16 %v180_v63, %v180_v63 }
  0xa8   :  { %216 = vst.msk [vmem:[%s448_s3 + $0x28] sm:$0xf] %vm205_vm1, %v199_v0 }
  0xa9   :  { %220 = vst.msk [vmem:[%s448_s3 + $0x38] sm:$0xf] %vm205_vm1, %v203_v1  ;;  %v160_v4 = vpop.f32.mrf.mxu2  ;;  %v170_v5 = vpop.f32.mrf.mxu3 }
  0xaa   :  { %209 = vst.msk [vmem:[%s448_s3 + $0xc] sm:$0xf] %vm205_vm1, %v192_v2  ;;  %v161_v6 = vadd.f32 %v363_v11, %v160_v4  ;;  %v171_v7 = vadd.f32 %v363_v11, %v170_v5 }
  0xab   :  { %213 = vst.msk [vmem:[%s448_s3 + $0x1c] sm:$0xf] %vm205_vm1, %v196_v3 }
  0xac   :  { %v184_v8 = vmax.f32 %v161_v6, 0.0  ;;  %v188_v9 = vmax.f32 %v171_v7, 0.0 }
  0xae   :  { %v200_v10 = vpack.c.bf16 %v184_v8, %v184_v8  ;;  %v204_v12 = vpack.c.bf16 %v188_v9, %v188_v9 }
  0xb0   :  { %217 = vst.msk [vmem:[%s448_s3 + $0x2c] sm:$0xf] %vm205_vm1, %v200_v10 }
  0xb1   :  { %221 = vst.msk [vmem:[%s448_s3 + $0x3c] sm:$0xf] %vm205_vm1, %v204_v12 }

// kernel: resnet_vqvae_forward.17
= control target key start
LH: loop header
LB: loop body
LE: loop exit
PB: predicated region body
PF: predicated region fallthrough
CT: control target
= control target key end

     0   :  { %vm201_vm0 = vcmask 261120   ;;  %vm269_vm1 = vcmask 257024   ;;  %s540_s1 = inlined_call_operand.vmem [shape: bf16[288,32], index: 1, kind: input, shape index: {}]   ;;  %s541_s0 = inlined_call_operand.vmem [shape: bf16[32,288], index: 0, kind: input, shape index: {}]   ;;  %s542_s2 = inlined_call_operand.vmem [shape: f32[1,32], index: 2, kind: input, shape index: {}]   ;;  %s543_s3 = inlined_call_operand.vmem [shape: bf16[32,32], index: 3, kind: output, shape index: {}]  }
   0x1   :  { %v389_v0 = vld [vmem:[%s540_s1 + $0x38] sm:$0xff]  ;;  %v388_v2 = vld [vmem:[%s540_s1 + $0x30] sm:$0xff]  ;;  %v399_v3 = vld [vmem:[%s540_s1 + $0x88] sm:$0xff] }
   0x2   :  { %v397_v1 = vld [vmem:[%s540_s1 + $0x78] sm:$0xff]  ;;  %208 = vmatpush.bf16.msra.mxu0 %v389_v0  ;;  %400 = vmatpush.bf16.msra.mxu3 %v389_v0  ;;  %v396_v4 = vld [vmem:[%s540_s1 + $0x70] sm:$0xff]  ;;  %v398_v5 = vld [vmem:[%s540_s1 + $0x80] sm:$0xff] }
   0x3   :  { %227 = vmatpush.bf16.msra.mxu1 %v397_v1  ;;  %252 = vmatpush.bf16.msra.mxu2 %v399_v3  ;;  %v288_v6 = vld [vmem:[%s541_s0 + $0x8] sm:$0xf]  ;;  %v378_v7 = vld [vmem:[%s541_s0 + $0x10] sm:$0xf0]  ;;  %v386_v11 = vld [vmem:[%s540_s1 + $0x20] sm:$0xff] }
   0x4   :  { %v387_v8 = vld [vmem:[%s540_s1 + $0x28] sm:$0xff]  ;;  %v289_v10 = vor.u32 %v378_v7, %v288_v6  ;;  %v394_v12 = vld [vmem:[%s540_s1 + $0x60] sm:$0xff]  ;;  %v385_v13 = vld [vmem:[%s540_s1 + $0x18] sm:$0xff] }
   0x5   :  { %v395_v9 = vld [vmem:[%s540_s1 + $0x68] sm:$0xff]  ;;  %v393_v14 = vld [vmem:[%s540_s1 + $0x58] sm:$0xff]  ;;  %v384_v15 = vld [vmem:[%s540_s1 + $0x10] sm:$0xff] }
   0x6   :  { %209 = vmatpush.bf16.msra.mxu0 %v388_v2  ;;  %401 = vmatpush.bf16.msra.mxu3 %v388_v2  ;;  %v392_v16 = vld [vmem:[%s540_s1 + $0x50] sm:$0xff]  ;;  %v300_v17 = vld [vmem:[%s541_s0 + $0x20] sm:$0xf]  ;;  %v381_v18 = vld [vmem:[%s541_s0 + $0x28] sm:$0xf0] }
   0x7   :  { %228 = vmatpush.bf16.msra.mxu1 %v396_v4  ;;  %253 = vmatpush.bf16.msra.mxu2 %v398_v5  ;;  %v383_v19 = vld [vmem:[%s540_s1 + $0x8] sm:$0xff]  ;;  %v301_v21 = vor.u32 %v381_v18, %v300_v17  ;;  %v382_v22 = vld [vmem:[%s540_s1] sm:$0xff]  ;;  %v292_v25 = vld [vmem:[%s541_s0 + $0x18] sm:$0xf] }
   0x8   :  { %v391_v20 = vld [vmem:[%s540_s1 + $0x48] sm:$0xff]  ;;  %v280_v23 = vld [vmem:[%s541_s0] sm:$0xf]  ;;  %v380_v26 = vld [vmem:[%s541_s0 + $0x20] sm:$0xf0] }
   0x9   :  { %v377_v24 = vld [vmem:[%s541_s0 + $0x8] sm:$0xf0]  ;;  %v390_v27 = vld [vmem:[%s540_s1 + $0x40] sm:$0xff]  ;;  %v282_v29 = vld [vmem:[%s541_s0 + $0xc] sm:$0xf0]  ;;  %v293_v31 = vor.u32 %v380_v26, %v292_v25 }
   0xa   :  { %210 = vmatpush.bf16.msra.mxu0 %v387_v8  ;;  %402 = vmatpush.bf16.msra.mxu3 %v387_v8  ;;  %v376_v28 = vld [vmem:[%s541_s0 + $0x4] sm:$0xf]  ;;  %v281_v30 = vor.u32 %v377_v24, %v280_v23  ;;  %v379_v33 = vld [vmem:[%s541_s0 + $0x1c] sm:$0xf]  ;;  %v294_v34 = vld [vmem:[%s541_s0 + $0x24] sm:$0xf0] }
   0xb   :  { %229 = vmatpush.bf16.msra.mxu1 %v395_v9  ;;  %374 = vmatmul.msk.bf16.vlgmr.msra.gmra.mxu2 %vm201_vm0, %v289_v10  ;;  %v285_v32 = vor.u32 %v376_v28, %v282_v29  ;;  %v297_v35 = vor.u32 %v379_v33, %v294_v34  ;;  %v408_v37 = vld [vmem:[%s542_s2] ss:$0 sm:$0xff] }
   0xe   :  { %211 = vmatpush.bf16.msra.mxu0 %v386_v11  ;;  %403 = vmatpush.bf16.msra.mxu3 %v386_v11 }
   0xf   :  { %230 = vmatpush.bf16.msra.mxu1 %v394_v12 }
  0x12   :  { %212 = vmatpush.bf16.msra.mxu0 %v385_v13  ;;  %404 = vmatpush.bf16.msra.mxu3 %v385_v13 }
  0x13   :  { %231 = vmatpush.bf16.msra.mxu1 %v393_v14 }
  0x16   :  { %213 = vmatpush.bf16.msra.mxu0 %v384_v15  ;;  %405 = vmatpush.bf16.msra.mxu3 %v384_v15 }
  0x17   :  { %232 = vmatpush.bf16.msra.mxu1 %v392_v16 }
  0x1a   :  { %214 = vmatpush.bf16.msra.mxu0 %v383_v19  ;;  %406 = vmatpush.bf16.msra.mxu3 %v383_v19 }
  0x1b   :  { %233 = vmatpush.bf16.msra.mxu1 %v391_v20  ;;  %375 = vmatmul.msk.bf16.gmra.mxu2 %vm201_vm0, %v301_v21 }
  0x1e   :  { %215 = vmatpush.bf16.msra.mxu0 %v382_v22  ;;  %407 = vmatpush.bf16.msra.mxu3 %v382_v22 }
  0x1f   :  { %234 = vmatpush.bf16.msra.mxu1 %v390_v27 }
  0x21   :  { %216 = vmatmul.bf16.vlgmr.msra.gmra.mxu0 %v281_v30  ;;  %221 = vmatmul.bf16.vlgmr.msra.gmra.mxu3 %v293_v31 }
  0x22   :  { %235 = vmatmul.bf16.vlgmr.msra.gmra.mxu1 %v285_v32 }
  0x32   :  { %240 = vmatmul.bf16.gmra.mxu1 %v297_v35 }
  0x8e   :  { %v255_v36 = vpop.f32.mrf.mxu2 }
  0x96   :  { %v257_v44 = vpop.f32.mrf.mxu2 }
  0x9e   :  { %v217_v38 = vpop.f32.mrf.mxu0  ;;  %v260_v53 = vpop.f32.mrf.mxu2 }
  0x9f   :  { %v218_v39 = vadd.f32 %v408_v37, %v217_v38  ;;  %v236_v40 = vpop.f32.mrf.mxu1 }
  0xa1   :  { %v237_v41 = vadd.f32 %v236_v40, %v218_v39 }
  0xa3   :  { %v256_v42 = vadd.f32 %v255_v36, %v237_v41 }
  0xa4   :  { %v222_v48 = vpop.f32.mrf.mxu3 }
  0xa5   :  { %v265_v43 = vpack.c.bf16 %v256_v42, %v256_v42  ;;  %v223_v51 = vadd.f32 %v408_v37, %v222_v48 }
  0xa6   :  { %v219_v45 = vpop.f32.mrf.mxu0  ;;  %v262_v62 = vpop.f32.mrf.mxu2 }
  0xa7   :  { %270 = vst.msk [vmem:[%s543_s3] sm:$0xf] %vm269_vm1, %v265_v43  ;;  %v220_v46 = vadd.f32 %v408_v37, %v219_v45  ;;  %v238_v47 = vpop.f32.mrf.mxu1 }
  0xa9   :  { %v239_v49 = vadd.f32 %v238_v47, %v220_v46 }
  0xab   :  { %v258_v50 = vadd.f32 %v257_v44, %v239_v49 }
  0xac   :  { %v224_v57 = vpop.f32.mrf.mxu3 }
  0xad   :  { %v266_v52 = vpack.c.bf16 %v258_v50, %v258_v50  ;;  %v225_v59 = vadd.f32 %v408_v37, %v224_v57 }
  0xaf   :  { %271 = vst.msk [vmem:[%s543_s3 + $0x4] sm:$0xf] %vm269_vm1, %v266_v52  ;;  %v241_v54 = vpop.f32.mrf.mxu1 }
  0xb0   :  { %v242_v55 = vadd.f32 %v241_v54, %v223_v51 }
  0xb2   :  { %v261_v56 = vadd.f32 %v260_v53, %v242_v55 }
  0xb4   :  { %v267_v58 = vpack.c.bf16 %v261_v56, %v261_v56 }
  0xb6   :  { %272 = vst.msk [vmem:[%s543_s3 + $0x8] sm:$0xf] %vm269_vm1, %v267_v58 }
  0xb7   :  { %v243_v60 = vpop.f32.mrf.mxu1 }
  0xb8   :  { %v244_v61 = vadd.f32 %v243_v60, %v225_v59 }
  0xba   :  { %v263_v63 = vadd.f32 %v262_v62, %v244_v61 }
  0xbc   :  { %v268_v0 = vpack.c.bf16 %v263_v63, %v263_v63 }
  0xbe   :  { %273 = vst.msk [vmem:[%s543_s3 + $0xc] sm:$0xf] %vm269_vm1, %v268_v0 }

// kernel: resnet_vqvae_forward.16
= control target key start
LH: loop header
LB: loop body
LE: loop exit
PB: predicated region body
PF: predicated region fallthrough
CT: control target
= control target key end

     0   :  { %vm216_vm0 = vcmask 257024   ;;  %s453_s1 = inlined_call_operand.vmem [shape: bf16[256,32], index: 1, kind: input, shape index: {}]   ;;  %s454_s2 = inlined_call_operand.vmem [shape: f32[1,32], index: 2, kind: input, shape index: {}]   ;;  %s455_s0 = inlined_call_operand.vmem [shape: bf16[32,256], index: 0, kind: input, shape index: {}]   ;;  %s456_s3 = inlined_call_operand.vmem [shape: bf16[32,32], index: 3, kind: output, shape index: {}]  }
   0x1   :  { %v316_v0 = vld [vmem:[%s453_s1 + $0x38] sm:$0xff]  ;;  %v315_v2 = vld [vmem:[%s453_s1 + $0x30] sm:$0xff]  ;;  %v314_v4 = vld [vmem:[%s453_s1 + $0x28] sm:$0xff] }
   0x2   :  { %v324_v1 = vld [vmem:[%s453_s1 + $0x78] sm:$0xff]  ;;  %170 = vmatpush.bf16.msra.mxu0 %v316_v0  ;;  %325 = vmatpush.bf16.msra.mxu2 %v316_v0  ;;  %v323_v3 = vld [vmem:[%s453_s1 + $0x70] sm:$0xff]  ;;  %v322_v5 = vld [vmem:[%s453_s1 + $0x68] sm:$0xff] }
   0x3   :  { %189 = vmatpush.bf16.msra.mxu1 %v324_v1  ;;  %333 = vmatpush.bf16.msra.mxu3 %v324_v1  ;;  %v313_v6 = vld [vmem:[%s453_s1 + $0x20] sm:$0xff]  ;;  %v312_v8 = vld [vmem:[%s453_s1 + $0x18] sm:$0xff]  ;;  %v311_v10 = vld [vmem:[%s453_s1 + $0x10] sm:$0xff] }
   0x4   :  { %v321_v7 = vld [vmem:[%s453_s1 + $0x60] sm:$0xff]  ;;  %v320_v9 = vld [vmem:[%s453_s1 + $0x58] sm:$0xff]  ;;  %v319_v11 = vld [vmem:[%s453_s1 + $0x50] sm:$0xff] }
   0x5   :  { %v310_v12 = vld [vmem:[%s453_s1 + $0x8] sm:$0xff]  ;;  %v309_v14 = vld [vmem:[%s453_s1] sm:$0xff]  ;;  %v235_v18 = vld [vmem:[%s455_s0 + $0x10] sm:$0xf] }
   0x6   :  { %171 = vmatpush.bf16.msra.mxu0 %v315_v2  ;;  %326 = vmatpush.bf16.msra.mxu2 %v315_v2  ;;  %v318_v13 = vld [vmem:[%s453_s1 + $0x48] sm:$0xff]  ;;  %v317_v15 = vld [vmem:[%s453_s1 + $0x40] sm:$0xff]  ;;  %v308_v19 = vld [vmem:[%s455_s0 + $0x14] sm:$0xf0] }
   0x7   :  { %190 = vmatpush.bf16.msra.mxu1 %v323_v3  ;;  %334 = vmatpush.bf16.msra.mxu3 %v323_v3  ;;  %v227_v16 = vld [vmem:[%s455_s0] sm:$0xf]  ;;  %v306_v17 = vld [vmem:[%s455_s0 + $0x4] sm:$0xf0]  ;;  %v305_v20 = vld [vmem:[%s455_s0 + $0x4] sm:$0xf]  ;;  %v236_v25 = vor.u32 %v308_v19, %v235_v18 }
   0x8   :  { %v229_v21 = vld [vmem:[%s455_s0 + $0x8] sm:$0xf0]  ;;  %v307_v22 = vld [vmem:[%s455_s0 + $0x14] sm:$0xf]  ;;  %v237_v23 = vld [vmem:[%s455_s0 + $0x18] sm:$0xf0]  ;;  %v228_v24 = vor.u32 %v306_v17, %v227_v16 }
   0x9   :  { %v232_v26 = vor.u32 %v305_v20, %v229_v21  ;;  %v240_v27 = vor.u32 %v307_v22, %v237_v23  ;;  %v341_v28 = vld [vmem:[%s454_s2] ss:$0 sm:$0xff] }
   0xa   :  { %172 = vmatpush.bf16.msra.mxu0 %v314_v4  ;;  %327 = vmatpush.bf16.msra.mxu2 %v314_v4 }
   0xb   :  { %191 = vmatpush.bf16.msra.mxu1 %v322_v5  ;;  %335 = vmatpush.bf16.msra.mxu3 %v322_v5 }
   0xe   :  { %173 = vmatpush.bf16.msra.mxu0 %v313_v6  ;;  %328 = vmatpush.bf16.msra.mxu2 %v313_v6 }
   0xf   :  { %192 = vmatpush.bf16.msra.mxu1 %v321_v7  ;;  %336 = vmatpush.bf16.msra.mxu3 %v321_v7 }
  0x12   :  { %174 = vmatpush.bf16.msra.mxu0 %v312_v8  ;;  %329 = vmatpush.bf16.msra.mxu2 %v312_v8 }
  0x13   :  { %193 = vmatpush.bf16.msra.mxu1 %v320_v9  ;;  %337 = vmatpush.bf16.msra.mxu3 %v320_v9 }
  0x16   :  { %175 = vmatpush.bf16.msra.mxu0 %v311_v10  ;;  %330 = vmatpush.bf16.msra.mxu2 %v311_v10 }
  0x17   :  { %194 = vmatpush.bf16.msra.mxu1 %v319_v11  ;;  %338 = vmatpush.bf16.msra.mxu3 %v319_v11 }
  0x1a   :  { %176 = vmatpush.bf16.msra.mxu0 %v310_v12  ;;  %331 = vmatpush.bf16.msra.mxu2 %v310_v12 }
  0x1b   :  { %195 = vmatpush.bf16.msra.mxu1 %v318_v13  ;;  %339 = vmatpush.bf16.msra.mxu3 %v318_v13 }
  0x1e   :  { %177 = vmatpush.bf16.msra.mxu0 %v309_v14  ;;  %332 = vmatpush.bf16.msra.mxu2 %v309_v14 }
  0x1f   :  { %196 = vmatpush.bf16.msra.mxu1 %v317_v15  ;;  %340 = vmatpush.bf16.msra.mxu3 %v317_v15 }
  0x21   :  { %178 = vmatmul.bf16.vlgmr.msra.gmra.mxu0 %v228_v24  ;;  %183 = vmatmul.bf16.vlgmr.msra.gmra.mxu2 %v236_v25 }
  0x22   :  { %197 = vmatmul.bf16.vlgmr.msra.gmra.mxu1 %v232_v26  ;;  %202 = vmatmul.bf16.vlgmr.msra.gmra.mxu3 %v240_v27 }
  0x9e   :  { %v179_v29 = vpop.f32.mrf.mxu0 }
  0x9f   :  { %v180_v30 = vadd.f32 %v341_v28, %v179_v29  ;;  %v198_v31 = vpop.f32.mrf.mxu1 }
  0xa1   :  { %v199_v32 = vadd.f32 %v198_v31, %v180_v30 }
  0xa3   :  { %v208_v33 = vmax.f32 %v199_v32, 0.0 }
  0xa4   :  { %v184_v34 = vpop.f32.mrf.mxu2 }
  0xa5   :  { %v212_v35 = vpack.c.bf16 %v208_v33, %v208_v33  ;;  %v185_v36 = vadd.f32 %v341_v28, %v184_v34  ;;  %v203_v37 = vpop.f32.mrf.mxu3 }
  0xa6   :  { %v181_v38 = vpop.f32.mrf.mxu0 }
  0xa7   :  { %217 = vst.msk [vmem:[%s456_s3] sm:$0xf] %vm216_vm0, %v212_v35  ;;  %v204_v39 = vadd.f32 %v203_v37, %v185_v36  ;;  %v182_v40 = vadd.f32 %v341_v28, %v181_v38  ;;  %v200_v41 = vpop.f32.mrf.mxu1 }
  0xa9   :  { %v210_v42 = vmax.f32 %v204_v39, 0.0  ;;  %v201_v43 = vadd.f32 %v200_v41, %v182_v40 }
  0xab   :  { %v214_v44 = vpack.c.bf16 %v210_v42, %v210_v42  ;;  %v209_v45 = vmax.f32 %v201_v43, 0.0 }
  0xac   :  { %v186_v46 = vpop.f32.mrf.mxu2 }
  0xad   :  { %219 = vst.msk [vmem:[%s456_s3 + $0x8] sm:$0xf] %vm216_vm0, %v214_v44  ;;  %v213_v47 = vpack.c.bf16 %v209_v45, %v209_v45  ;;  %v187_v48 = vadd.f32 %v341_v28, %v186_v46  ;;  %v205_v49 = vpop.f32.mrf.mxu3 }
  0xaf   :  { %218 = vst.msk [vmem:[%s456_s3 + $0x4] sm:$0xf] %vm216_vm0, %v213_v47  ;;  %v206_v50 = vadd.f32 %v205_v49, %v187_v48 }
  0xb1   :  { %v211_v51 = vmax.f32 %v206_v50, 0.0 }
  0xb3   :  { %v215_v52 = vpack.c.bf16 %v211_v51, %v211_v51 }
  0xb5   :  { %220 = vst.msk [vmem:[%s456_s3 + $0xc] sm:$0xf] %vm216_vm0, %v215_v52 }

// kernel: resnet_vqvae_forward.19
= control target key start
LH: loop header
LB: loop body
LE: loop exit
PB: predicated region body
PF: predicated region fallthrough
CT: control target
= control target key end

     0   :  { %vm44_vm0 = vcmask 130048   ;;  %vm86_vm1 = vcmask 257024   ;;  %s182_s1 = inlined_call_operand.vmem [shape: bf16[16,32], index: 1, kind: input, shape index: {}]   ;;  %s183_s0 = inlined_call_operand.vmem [shape: bf16[32,16], index: 0, kind: input, shape index: {}]   ;;  %s184_s2 = inlined_call_operand.vmem [shape: f32[1,32], index: 2, kind: input, shape index: {}]   ;;  %s185_s3 = inlined_call_operand.vmem [shape: bf16[32,32], index: 3, kind: input, shape index: {}]   ;;  %s186_s4 = inlined_call_operand.vmem [shape: bf16[32,32], index: 4, kind: output, shape index: {}]  }
   0x1   :  { %v111_v0 = vld [vmem:[%s182_s1] sm:$0xff]  ;;  %v110_v2 = vld [vmem:[%s183_s0 + $0x8] sm:$0xff] }
   0x2   :  { %v109_v1 = vld [vmem:[%s183_s0] sm:$0xff]  ;;  %58 = vmatpush.bf16.msra.mxu0 %v111_v0  ;;  %121 = vmatpush.bf16.msra.mxu1 %v111_v0  ;;  %v120_v4 = vld [vmem:[%s185_s3 + $0x8] sm:$0xff]  }
   0x3   :  { %v113_v3 = vld [vmem:[%s185_s3] sm:$0xff]   ;;  %v118_v7 = vunpack.c.l.bf16 %v120_v4  ;;  %v119_v17 = vunpack.c.h.bf16 %v120_v4 }
   0x4   :  { %v122_v5 = vld [vmem:[%s184_s2] ss:$0 sm:$0xff]  ;;  %v114_v6 = vunpack.c.l.bf16 %v113_v3  ;;  %v115_v16 = vunpack.c.h.bf16 %v113_v3 }
   0x5   :  { %107 = vmatmul.msk.bf16.vlgmr.msra.gmra.mxu0 %vm44_vm0, %v109_v1  ;;  %108 = vmatmul.msk.bf16.vlgmr.msra.gmra.mxu1 %vm44_vm0, %v110_v2 }
  0x82   :  { %v60_v8 = vpop.f32.mrf.mxu0  ;;  %v65_v9 = vpop.f32.mrf.mxu1 }
  0x83   :  { %v61_v10 = vadd.f32 %v122_v5, %v60_v8  ;;  %v66_v11 = vadd.f32 %v122_v5, %v65_v9 }
  0x85   :  { %v78_v12 = vadd.f32 %v114_v6, %v61_v10  ;;  %v80_v13 = vadd.f32 %v118_v7, %v66_v11 }
  0x87   :  { %v82_v14 = vpack.c.bf16 %v78_v12, %v78_v12  ;;  %v84_v15 = vpack.c.bf16 %v80_v13, %v80_v13 }
  0x89   :  { %87 = vst.msk [vmem:[%s186_s4] sm:$0xf] %vm86_vm1, %v82_v14 }
  0x8a   :  { %89 = vst.msk [vmem:[%s186_s4 + $0x8] sm:$0xf] %vm86_vm1, %v84_v15  ;;  %v62_v18 = vpop.f32.mrf.mxu0  ;;  %v67_v19 = vpop.f32.mrf.mxu1 }
  0x8b   :  { %v63_v20 = vadd.f32 %v122_v5, %v62_v18  ;;  %v68_v21 = vadd.f32 %v122_v5, %v67_v19 }
  0x8d   :  { %v79_v22 = vadd.f32 %v115_v16, %v63_v20  ;;  %v81_v23 = vadd.f32 %v119_v17, %v68_v21 }
  0x8f   :  { %v83_v24 = vpack.c.bf16 %v79_v22, %v79_v22  ;;  %v85_v25 = vpack.c.bf16 %v81_v23, %v81_v23 }
  0x91   :  { %88 = vst.msk [vmem:[%s186_s4 + $0x4] sm:$0xf] %vm86_vm1, %v83_v24 }
  0x92   :  { %90 = vst.msk [vmem:[%s186_s4 + $0xc] sm:$0xf] %vm86_vm1, %v85_v25 }

// kernel: resnet_vqvae_forward.18
= control target key start
LH: loop header
LB: loop body
LE: loop exit
PB: predicated region body
PF: predicated region fallthrough
CT: control target
= control target key end

     0   :  { %vm201_vm0 = vcmask 261120   ;;  %vm273_vm1 = vcmask 125952   ;;  %s502_s1 = inlined_call_operand.vmem [shape: bf16[288,16], index: 1, kind: input, shape index: {}]   ;;  %s503_s0 = inlined_call_operand.vmem [shape: bf16[32,288], index: 0, kind: input, shape index: {}]   ;;  %s504_s2 = inlined_call_operand.vmem [shape: f32[1,16], index: 2, kind: input, shape index: {}]   ;;  %s505_s3 = inlined_call_operand.vmem [shape: bf16[32,16], index: 3, kind: output, shape index: {}]  }
   0x1   :  { %v363_v0 = vld [vmem:[%s502_s1 + $0x38] sm:$0xff]  ;;  %v362_v2 = vld [vmem:[%s502_s1 + $0x30] sm:$0xff]  ;;  %v373_v3 = vld [vmem:[%s502_s1 + $0x88] sm:$0xff] }
   0x2   :  { %v371_v1 = vld [vmem:[%s502_s1 + $0x78] sm:$0xff]  ;;  %208 = vmatpush.bf16.msra.mxu0 %v363_v0  ;;  %374 = vmatpush.bf16.msra.mxu3 %v363_v0  ;;  %v370_v4 = vld [vmem:[%s502_s1 + $0x70] sm:$0xff]  ;;  %v372_v5 = vld [vmem:[%s502_s1 + $0x80] sm:$0xff] }
   0x3   :  { %227 = vmatpush.bf16.msra.mxu1 %v371_v1  ;;  %252 = vmatpush.bf16.msra.mxu2 %v373_v3  ;;  %v16_v6 = vld [vmem:[%s503_s0 + $0x8] sm:$0xf]  ;;  %v18_v7 = vld [vmem:[%s503_s0 + $0x14] sm:$0xf]  ;;  %v360_v15 = vld [vmem:[%s502_s1 + $0x20] sm:$0xff] }
   0x4   :  { %v25_v8 = vunpack.c.l.bf16 %v16_v6  ;;  %v28_v9 = vunpack.c.l.bf16 %v18_v7  ;;  %v361_v10 = vld [vmem:[%s502_s1 + $0x28] sm:$0xff]  ;;  %v368_v16 = vld [vmem:[%s502_s1 + $0x60] sm:$0xff]  ;;  %v359_v19 = vld [vmem:[%s502_s1 + $0x18] sm:$0xff] }
   0x5   :  { %v369_v11 = vld [vmem:[%s502_s1 + $0x68] sm:$0xff]  ;;  %v20_v17 = vld [vmem:[%s503_s0 + $0x20] sm:$0xf]  ;;  %v367_v20 = vld [vmem:[%s502_s1 + $0x58] sm:$0xff] }
   0x6   :  { %209 = vmatpush.bf16.msra.mxu0 %v362_v2  ;;  %375 = vmatpush.bf16.msra.mxu3 %v362_v2  ;;  %v37_v12 = vmax.f32 %v25_v8, 0.0  ;;  %v40_v13 = vmax.f32 %v28_v9, 0.0  ;;  %v22_v18 = vld [vmem:[%s503_s0 + $0x2c] sm:$0xf]  ;;  %v31_v21 = vunpack.c.l.bf16 %v20_v17  ;;  %v358_v23 = vld [vmem:[%s502_s1 + $0x10] sm:$0xff]  ;;  %v15_v24 = vld [vmem:[%s503_s0] sm:$0xff] }
   0x7   :  { %228 = vmatpush.bf16.msra.mxu1 %v370_v4  ;;  %253 = vmatpush.bf16.msra.mxu2 %v372_v5  ;;  %v34_v22 = vunpack.c.l.bf16 %v22_v18  ;;  %v17_v25 = vld [vmem:[%s503_s0 + $0xc] sm:$0xff]  ;;  %v19_v26 = vld [vmem:[%s503_s0 + $0x18] sm:$0xff]  ;;  %v21_v27 = vld [vmem:[%s503_s0 + $0x24] sm:$0xff]  ;;  %v23_v31 = vunpack.c.l.bf16 %v15_v24  ;;  %v24_v36 = vunpack.c.h.bf16 %v15_v24 }
   0x8   :  { %v49_v14 = vpack.c.bf16 %v40_v13, %v37_v12  ;;  %v366_v28 = vld [vmem:[%s502_s1 + $0x50] sm:$0xff]  ;;  %v43_v29 = vmax.f32 %v31_v21, 0.0  ;;  %v26_v32 = vunpack.c.l.bf16 %v17_v25  ;;  %v29_v33 = vunpack.c.l.bf16 %v19_v26  ;;  %v357_v35 = vld [vmem:[%s502_s1 + $0x8] sm:$0xff]  ;;  %v356_v44 = vld [vmem:[%s502_s1] sm:$0xff] }
   0x9   :  { %v46_v30 = vmax.f32 %v34_v22, 0.0  ;;  %v32_v34 = vunpack.c.l.bf16 %v21_v27  ;;  %v27_v37 = vunpack.c.h.bf16 %v17_v25  ;;  %v365_v38 = vld [vmem:[%s502_s1 + $0x48] sm:$0xff]  ;;  %v35_v40 = vmax.f32 %v23_v31, 0.0  ;;  %v364_v47 = vld [vmem:[%s502_s1 + $0x40] sm:$0xff] }
   0xa   :  { %210 = vmatpush.bf16.msra.mxu0 %v361_v10  ;;  %376 = vmatpush.bf16.msra.mxu3 %v361_v10  ;;  %v38_v41 = vmax.f32 %v26_v32, 0.0  ;;  %v41_v42 = vmax.f32 %v29_v33, 0.0  ;;  %v36_v45 = vmax.f32 %v24_v36, 0.0  ;;  %v30_v51 = vunpack.c.h.bf16 %v19_v26  ;;  %v382_v57 = vld [vmem:[%s504_s2] ss:$0 sm:$0xff] }
   0xb   :  { %229 = vmatpush.bf16.msra.mxu1 %v369_v11  ;;  %354 = vmatmul.msk.bf16.vlgmr.msra.gmra.mxu2 %vm201_vm0, %v49_v14  ;;  %v52_v39 = vpack.c.bf16 %v46_v30, %v43_v29  ;;  %v44_v43 = vmax.f32 %v32_v34, 0.0  ;;  %v39_v46 = vmax.f32 %v27_v37, 0.0  ;;  %v33_v52 = vunpack.c.h.bf16 %v21_v27 }
   0xc   :  { %v47_v48 = vpack.c.bf16 %v38_v41, %v35_v40  ;;  %v42_v53 = vmax.f32 %v30_v51, 0.0 }
   0xd   :  { %v50_v49 = vpack.c.bf16 %v44_v43, %v41_v42  ;;  %v48_v50 = vpack.c.bf16 %v39_v46, %v36_v45  ;;  %v45_v54 = vmax.f32 %v33_v52, 0.0 }
   0xe   :  { %211 = vmatpush.bf16.msra.mxu0 %v360_v15  ;;  %377 = vmatpush.bf16.msra.mxu3 %v360_v15 }
   0xf   :  { %230 = vmatpush.bf16.msra.mxu1 %v368_v16  ;;  %v51_v55 = vpack.c.bf16 %v45_v54, %v42_v53 }
  0x12   :  { %212 = vmatpush.bf16.msra.mxu0 %v359_v19  ;;  %378 = vmatpush.bf16.msra.mxu3 %v359_v19 }
  0x13   :  { %231 = vmatpush.bf16.msra.mxu1 %v367_v20 }
  0x16   :  { %213 = vmatpush.bf16.msra.mxu0 %v358_v23  ;;  %379 = vmatpush.bf16.msra.mxu3 %v358_v23 }
  0x17   :  { %232 = vmatpush.bf16.msra.mxu1 %v366_v28 }
  0x1a   :  { %214 = vmatpush.bf16.msra.mxu0 %v357_v35  ;;  %380 = vmatpush.bf16.msra.mxu3 %v357_v35 }
  0x1b   :  { %233 = vmatpush.bf16.msra.mxu1 %v365_v38  ;;  %355 = vmatmul.msk.bf16.gmra.mxu2 %vm201_vm0, %v52_v39 }
  0x1e   :  { %215 = vmatpush.bf16.msra.mxu0 %v356_v44  ;;  %381 = vmatpush.bf16.msra.mxu3 %v356_v44 }
  0x1f   :  { %234 = vmatpush.bf16.msra.mxu1 %v364_v47 }
  0x21   :  { %216 = vmatmul.bf16.vlgmr.msra.gmra.mxu0 %v47_v48  ;;  %221 = vmatmul.bf16.vlgmr.msra.gmra.mxu3 %v50_v49 }
  0x22   :  { %235 = vmatmul.bf16.vlgmr.msra.gmra.mxu1 %v48_v50 }
  0x32   :  { %240 = vmatmul.bf16.gmra.mxu1 %v51_v55 }
  0x8e   :  { %v255_v56 = vpop.f32.mrf.mxu2 }
  0x96   :  { %v257_v0 = vpop.f32.mrf.mxu2 }
  0x9e   :  { %v217_v58 = vpop.f32.mrf.mxu0  ;;  %v260_v11 = vpop.f32.mrf.mxu2 }
  0x9f   :  { %v218_v59 = vadd.f32 %v382_v57, %v217_v58  ;;  %v236_v60 = vpop.f32.mrf.mxu1 }
  0xa1   :  { %v237_v61 = vadd.f32 %v236_v60, %v218_v59 }
  0xa3   :  { %v256_v62 = vadd.f32 %v255_v56, %v237_v61 }
  0xa4   :  { %v222_v5 = vpop.f32.mrf.mxu3 }
  0xa5   :  { %v265_v63 = vmax.f32 %v256_v62, 0.0  ;;  %v223_v8 = vadd.f32 %v382_v57, %v222_v5 }
  0xa6   :  { %v219_v1 = vpop.f32.mrf.mxu0  ;;  %v262_v21 = vpop.f32.mrf.mxu2 }
  0xa7   :  { %v269_v2 = vpack.c.bf16 %v265_v63, %v265_v63  ;;  %v220_v3 = vadd.f32 %v382_v57, %v219_v1  ;;  %v238_v4 = vpop.f32.mrf.mxu1 }
  0xa9   :  { %274 = vst.msk [vmem:[%s505_s3] sm:$0xf] %vm273_vm1, %v269_v2  ;;  %v239_v6 = vadd.f32 %v238_v4, %v220_v3 }
  0xab   :  { %v258_v7 = vadd.f32 %v257_v0, %v239_v6 }
  0xac   :  { %v224_v15 = vpop.f32.mrf.mxu3 }
  0xad   :  { %v266_v9 = vmax.f32 %v258_v7, 0.0  ;;  %v225_v17 = vadd.f32 %v382_v57, %v224_v15 }
  0xaf   :  { %v270_v10 = vpack.c.bf16 %v266_v9, %v266_v9  ;;  %v241_v12 = vpop.f32.mrf.mxu1 }
  0xb0   :  { %v242_v13 = vadd.f32 %v241_v12, %v223_v8 }
  0xb1   :  { %275 = vst.msk [vmem:[%s505_s3 + $0x4] sm:$0xf] %vm273_vm1, %v270_v10 }
  0xb2   :  { %v261_v14 = vadd.f32 %v260_v11, %v242_v13 }
  0xb4   :  { %v267_v16 = vmax.f32 %v261_v14, 0.0 }
  0xb6   :  { %v271_v18 = vpack.c.bf16 %v267_v16, %v267_v16 }
  0xb7   :  { %v243_v19 = vpop.f32.mrf.mxu1 }
  0xb8   :  { %276 = vst.msk [vmem:[%s505_s3 + $0x8] sm:$0xf] %vm273_vm1, %v271_v18  ;;  %v244_v20 = vadd.f32 %v243_v19, %v225_v17 }
  0xba   :  { %v263_v22 = vadd.f32 %v262_v21, %v244_v20 }
  0xbc   :  { %v268_v23 = vmax.f32 %v263_v22, 0.0 }
  0xbe   :  { %v272_v24 = vpack.c.bf16 %v268_v23, %v268_v23 }
  0xc0   :  { %277 = vst.msk [vmem:[%s505_s3 + $0xc] sm:$0xf] %vm273_vm1, %v272_v24 }

// kernel: resnet_vqvae_forward.28
= control target key start
LH: loop header
LB: loop body
LE: loop exit
PB: predicated region body
PF: predicated region fallthrough
CT: control target
= control target key end

     0   :  { %vm201_vm0 = vcmask 261120   ;;  %vm273_vm1 = vcmask 519168   ;;  %s502_s1 = inlined_call_operand.vmem [shape: bf16[288,64], index: 1, kind: input, shape index: {}]   ;;  %s503_s0 = inlined_call_operand.vmem [shape: bf16[32,288], index: 0, kind: input, shape index: {}]   ;;  %s504_s2 = inlined_call_operand.vmem [shape: f32[1,64], index: 2, kind: input, shape index: {}]   ;;  %s505_s3 = inlined_call_operand.vmem [shape: bf16[32,64], index: 3, kind: output, shape index: {}]  }
   0x1   :  { %v363_v0 = vld [vmem:[%s502_s1 + $0x38] sm:$0xff]  ;;  %v362_v2 = vld [vmem:[%s502_s1 + $0x30] sm:$0xff]  ;;  %v373_v3 = vld [vmem:[%s502_s1 + $0x88] sm:$0xff] }
   0x2   :  { %v371_v1 = vld [vmem:[%s502_s1 + $0x78] sm:$0xff]  ;;  %208 = vmatpush.bf16.msra.mxu0 %v363_v0  ;;  %374 = vmatpush.bf16.msra.mxu3 %v363_v0  ;;  %v370_v4 = vld [vmem:[%s502_s1 + $0x70] sm:$0xff]  ;;  %v372_v5 = vld [vmem:[%s502_s1 + $0x80] sm:$0xff] }
   0x3   :  { %227 = vmatpush.bf16.msra.mxu1 %v371_v1  ;;  %252 = vmatpush.bf16.msra.mxu2 %v373_v3  ;;  %v16_v6 = vld [vmem:[%s503_s0 + $0x8] sm:$0xf]  ;;  %v18_v7 = vld [vmem:[%s503_s0 + $0x14] sm:$0xf]  ;;  %v360_v15 = vld [vmem:[%s502_s1 + $0x20] sm:$0xff] }
   0x4   :  { %v25_v8 = vunpack.c.l.bf16 %v16_v6  ;;  %v28_v9 = vunpack.c.l.bf16 %v18_v7  ;;  %v361_v10 = vld [vmem:[%s502_s1 + $0x28] sm:$0xff]  ;;  %v368_v16 = vld [vmem:[%s502_s1 + $0x60] sm:$0xff]  ;;  %v359_v19 = vld [vmem:[%s502_s1 + $0x18] sm:$0xff] }
   0x5   :  { %v369_v11 = vld [vmem:[%s502_s1 + $0x68] sm:$0xff]  ;;  %v20_v17 = vld [vmem:[%s503_s0 + $0x20] sm:$0xf]  ;;  %v367_v20 = vld [vmem:[%s502_s1 + $0x58] sm:$0xff] }
   0x6   :  { %209 = vmatpush.bf16.msra.mxu0 %v362_v2  ;;  %375 = vmatpush.bf16.msra.mxu3 %v362_v2  ;;  %v37_v12 = vmax.f32 %v25_v8, 0.0  ;;  %v40_v13 = vmax.f32 %v28_v9, 0.0  ;;  %v22_v18 = vld [vmem:[%s503_s0 + $0x2c] sm:$0xf]  ;;  %v31_v21 = vunpack.c.l.bf16 %v20_v17  ;;  %v358_v23 = vld [vmem:[%s502_s1 + $0x10] sm:$0xff]  ;;  %v15_v24 = vld [vmem:[%s503_s0] sm:$0xff] }
   0x7   :  { %228 = vmatpush.bf16.msra.mxu1 %v370_v4  ;;  %253 = vmatpush.bf16.msra.mxu2 %v372_v5  ;;  %v34_v22 = vunpack.c.l.bf16 %v22_v18  ;;  %v17_v25 = vld [vmem:[%s503_s0 + $0xc] sm:$0xff]  ;;  %v19_v26 = vld [vmem:[%s503_s0 + $0x18] sm:$0xff]  ;;  %v21_v27 = vld [vmem:[%s503_s0 + $0x24] sm:$0xff]  ;;  %v23_v31 = vunpack.c.l.bf16 %v15_v24  ;;  %v24_v36 = vunpack.c.h.bf16 %v15_v24 }
   0x8   :  { %v49_v14 = vpack.c.bf16 %v40_v13, %v37_v12  ;;  %v366_v28 = vld [vmem:[%s502_s1 + $0x50] sm:$0xff]  ;;  %v43_v29 = vmax.f32 %v31_v21, 0.0  ;;  %v26_v32 = vunpack.c.l.bf16 %v17_v25  ;;  %v29_v33 = vunpack.c.l.bf16 %v19_v26  ;;  %v357_v35 = vld [vmem:[%s502_s1 + $0x8] sm:$0xff]  ;;  %v356_v44 = vld [vmem:[%s502_s1] sm:$0xff] }
   0x9   :  { %v46_v30 = vmax.f32 %v34_v22, 0.0  ;;  %v32_v34 = vunpack.c.l.bf16 %v21_v27  ;;  %v27_v37 = vunpack.c.h.bf16 %v17_v25  ;;  %v365_v38 = vld [vmem:[%s502_s1 + $0x48] sm:$0xff]  ;;  %v35_v40 = vmax.f32 %v23_v31, 0.0  ;;  %v364_v47 = vld [vmem:[%s502_s1 + $0x40] sm:$0xff] }
   0xa   :  { %210 = vmatpush.bf16.msra.mxu0 %v361_v10  ;;  %376 = vmatpush.bf16.msra.mxu3 %v361_v10  ;;  %v38_v41 = vmax.f32 %v26_v32, 0.0  ;;  %v41_v42 = vmax.f32 %v29_v33, 0.0  ;;  %v36_v45 = vmax.f32 %v24_v36, 0.0  ;;  %v30_v51 = vunpack.c.h.bf16 %v19_v26  ;;  %v382_v57 = vld [vmem:[%s504_s2] ss:$0 sm:$0xff] }
   0xb   :  { %229 = vmatpush.bf16.msra.mxu1 %v369_v11  ;;  %354 = vmatmul.msk.bf16.vlgmr.msra.gmra.mxu2 %vm201_vm0, %v49_v14  ;;  %v52_v39 = vpack.c.bf16 %v46_v30, %v43_v29  ;;  %v44_v43 = vmax.f32 %v32_v34, 0.0  ;;  %v39_v46 = vmax.f32 %v27_v37, 0.0  ;;  %v33_v52 = vunpack.c.h.bf16 %v21_v27 }
   0xc   :  { %v47_v48 = vpack.c.bf16 %v38_v41, %v35_v40  ;;  %v42_v53 = vmax.f32 %v30_v51, 0.0 }
   0xd   :  { %v50_v49 = vpack.c.bf16 %v44_v43, %v41_v42  ;;  %v48_v50 = vpack.c.bf16 %v39_v46, %v36_v45  ;;  %v45_v54 = vmax.f32 %v33_v52, 0.0 }
   0xe   :  { %211 = vmatpush.bf16.msra.mxu0 %v360_v15  ;;  %377 = vmatpush.bf16.msra.mxu3 %v360_v15 }
   0xf   :  { %230 = vmatpush.bf16.msra.mxu1 %v368_v16  ;;  %v51_v55 = vpack.c.bf16 %v45_v54, %v42_v53 }
  0x12   :  { %212 = vmatpush.bf16.msra.mxu0 %v359_v19  ;;  %378 = vmatpush.bf16.msra.mxu3 %v359_v19 }
  0x13   :  { %231 = vmatpush.bf16.msra.mxu1 %v367_v20 }
  0x16   :  { %213 = vmatpush.bf16.msra.mxu0 %v358_v23  ;;  %379 = vmatpush.bf16.msra.mxu3 %v358_v23 }
  0x17   :  { %232 = vmatpush.bf16.msra.mxu1 %v366_v28 }
  0x1a   :  { %214 = vmatpush.bf16.msra.mxu0 %v357_v35  ;;  %380 = vmatpush.bf16.msra.mxu3 %v357_v35 }
  0x1b   :  { %233 = vmatpush.bf16.msra.mxu1 %v365_v38  ;;  %355 = vmatmul.msk.bf16.gmra.mxu2 %vm201_vm0, %v52_v39 }
  0x1e   :  { %215 = vmatpush.bf16.msra.mxu0 %v356_v44  ;;  %381 = vmatpush.bf16.msra.mxu3 %v356_v44 }
  0x1f   :  { %234 = vmatpush.bf16.msra.mxu1 %v364_v47 }
  0x21   :  { %216 = vmatmul.bf16.vlgmr.msra.gmra.mxu0 %v47_v48  ;;  %221 = vmatmul.bf16.vlgmr.msra.gmra.mxu3 %v50_v49 }
  0x22   :  { %235 = vmatmul.bf16.vlgmr.msra.gmra.mxu1 %v48_v50 }
  0x32   :  { %240 = vmatmul.bf16.gmra.mxu1 %v51_v55 }
  0x8e   :  { %v255_v56 = vpop.f32.mrf.mxu2 }
  0x96   :  { %v257_v0 = vpop.f32.mrf.mxu2 }
  0x9e   :  { %v217_v58 = vpop.f32.mrf.mxu0  ;;  %v260_v11 = vpop.f32.mrf.mxu2 }
  0x9f   :  { %v218_v59 = vadd.f32 %v382_v57, %v217_v58  ;;  %v236_v60 = vpop.f32.mrf.mxu1 }
  0xa1   :  { %v237_v61 = vadd.f32 %v236_v60, %v218_v59 }
  0xa3   :  { %v256_v62 = vadd.f32 %v255_v56, %v237_v61 }
  0xa4   :  { %v222_v5 = vpop.f32.mrf.mxu3 }
  0xa5   :  { %v265_v63 = vmax.f32 %v256_v62, 0.0  ;;  %v223_v8 = vadd.f32 %v382_v57, %v222_v5 }
  0xa6   :  { %v219_v1 = vpop.f32.mrf.mxu0  ;;  %v262_v21 = vpop.f32.mrf.mxu2 }
  0xa7   :  { %v269_v2 = vpack.c.bf16 %v265_v63, %v265_v63  ;;  %v220_v3 = vadd.f32 %v382_v57, %v219_v1  ;;  %v238_v4 = vpop.f32.mrf.mxu1 }
  0xa9   :  { %274 = vst.msk [vmem:[%s505_s3] sm:$0xf] %vm273_vm1, %v269_v2  ;;  %v239_v6 = vadd.f32 %v238_v4, %v220_v3 }
  0xab   :  { %v258_v7 = vadd.f32 %v257_v0, %v239_v6 }
  0xac   :  { %v224_v15 = vpop.f32.mrf.mxu3 }
  0xad   :  { %v266_v9 = vmax.f32 %v258_v7, 0.0  ;;  %v225_v17 = vadd.f32 %v382_v57, %v224_v15 }
  0xaf   :  { %v270_v10 = vpack.c.bf16 %v266_v9, %v266_v9  ;;  %v241_v12 = vpop.f32.mrf.mxu1 }
  0xb0   :  { %v242_v13 = vadd.f32 %v241_v12, %v223_v8 }
  0xb1   :  { %275 = vst.msk [vmem:[%s505_s3 + $0x4] sm:$0xf] %vm273_vm1, %v270_v10 }
  0xb2   :  { %v261_v14 = vadd.f32 %v260_v11, %v242_v13 }
  0xb4   :  { %v267_v16 = vmax.f32 %v261_v14, 0.0 }
  0xb6   :  { %v271_v18 = vpack.c.bf16 %v267_v16, %v267_v16 }
  0xb7   :  { %v243_v19 = vpop.f32.mrf.mxu1 }
  0xb8   :  { %276 = vst.msk [vmem:[%s505_s3 + $0x8] sm:$0xf] %vm273_vm1, %v271_v18  ;;  %v244_v20 = vadd.f32 %v243_v19, %v225_v17 }
  0xba   :  { %v263_v22 = vadd.f32 %v262_v21, %v244_v20 }
  0xbc   :  { %v268_v23 = vmax.f32 %v263_v22, 0.0 }
  0xbe   :  { %v272_v24 = vpack.c.bf16 %v268_v23, %v268_v23 }
  0xc0   :  { %277 = vst.msk [vmem:[%s505_s3 + $0xc] sm:$0xf] %vm273_vm1, %v272_v24 }

// kernel: resnet_vqvae_forward.22
= control target key start
LH: loop header
LB: loop body
LE: loop exit
PB: predicated region body
PF: predicated region fallthrough
CT: control target
= control target key end

     0   :  { %s664_s0 = inlined_call_operand.vmem [shape: bf16[32,32], index: 0, kind: input, shape index: {}]   ;;  %s665_s1 = inlined_call_operand.vmem [shape: bf16[32,8], index: 1, kind: input, shape index: {}]   ;;  %s666_s2 = inlined_call_operand.vmem [shape: f32[1,8], index: 2, kind: input, shape index: {}]   ;;  %s667_s3 = inlined_call_operand.vmem [shape: f32[16,8], index: 3, kind: input, shape index: {}]   ;;  %s668_s4 = inlined_call_operand.vmem [shape: f32[1,16], index: 4, kind: input, shape index: {}]   ;;  %s669_s5 = inlined_call_operand.vmem [shape: bf16[8,32], index: 5, kind: input, shape index: {}]   ;;  %s670_s6 = inlined_call_operand.vmem [shape: f32[1,32], index: 6, kind: input, shape index: {}]   ;;  %s671_s7 = inlined_call_operand.hbm [shape: f32[32,8], index: 7, kind: output, shape index: {0}]   ;;  %s672_s8 = inlined_call_operand.vmem [shape: bf16[32,32], index: 8, kind: output, shape index: {1}]   ;;  %s673_s9 = inlined_call_operand.vmem [shape: s32[32,1], index: 9, kind: output, shape index: {2}]   ;;  %s674_s10 = inlined_call_operand.vmem [shape: f32[8,128], index: 10, kind: output, shape index: {3}]  }
   0x1   :  { %v438_v0 = vld [vmem:[%s665_s1 + $0x8] sm:$0xff]  ;;  %v440_v1 = vld [vmem:[%s664_s0] sm:$0xff]  }
   0x2   :  { %v437_v2 = vld [vmem:[%s665_s1] sm:$0xff]  ;;  %v441_v3 = vunpack.c.l.bf16 %v440_v1  ;;  %v442_v4 = vunpack.c.h.bf16 %v440_v1  ;;  %79 = vmatpush.bf16.msra.mxu0 %v438_v0 }
   0x3   :  { %16 = vsyncpa [#allocation3], 0  ;;  %vm66_vm0 = vcmask 261120   ;;  %v447_v8 = vld [vmem:[%s664_s0 + $0x8] sm:$0xff]   ;;  %v92_v14 = vld [vmem:[%s667_s3] sm:$0xff]  ;;  %vm97_vm1 = vcmask 64512   ;;  %v138_v46 = vlaneseq }
   0x4   :  { %v40_v5 = vmax.f32 %v441_v3, 0.0  ;;  %v41_v6 = vmax.f32 %v442_v4, 0.0  ;;  %v445_v9 = vunpack.c.l.bf16 %v447_v8  ;;  %v446_v10 = vunpack.c.h.bf16 %v447_v8  ;;  %v93_v15 = vld [vmem:[%s667_s3 + $0x8] sm:$0xff]  ;;  %v454_v19 = vld [vmem:[%s666_s2] ss:$0 sm:$0xff]  ;;  %s391_s16 = sshll.u32 %s671_s7, 4  ;;  %s392_s16 = int_to_ptr.hbm [resolvable:$true] %s391_s16 }
   0x5   :  { %v96_v16 = vpack.c.bf16 %v93_v15, %v92_v14  ;;  %259 = vmatpush.msra.mxu2 %v93_v15  ;;  %v455_v29 = vld [vmem:[%s668_s4] ss:$0 sm:$0xff]  ;;  %vm140_vm2 = vcmask 130048   ;;  %v586_v47 = vand.u32 127, %v138_v46  ;;  %vm278_vm11 = vcmask 7168   ;;  %s485_s17 = smov 128  }
   0x6   :  { %v44_v7 = vpack.c.bf16 %v41_v6, %v40_v5  ;;  %80 = vmatpush.bf16.msra.mxu0 %v437_v2  ;;  %v42_v11 = vmax.f32 %v445_v9, 0.0  ;;  %v43_v12 = vmax.f32 %v446_v10, 0.0  ;;  %s486_s18 = smov 8  }
   0x7   :  { %v105_v17 = vsel %vm97_vm1, %v96_v16, 0  ;;  %260 = vmatpush.msra.mxu2 %v92_v14 }
   0x8   :  { %v45_v13 = vpack.c.bf16 %v43_v12, %v42_v11  ;;  %114 = vmatpush.bf16.xpose.msra.mxu1 %v105_v17 }
   0x9   :  { %423 = vmatmul.msk.bf16.vlgmr.msra.gmra.mxu0 %vm66_vm0, %v44_v7 }
  0x19   :  { %424 = vmatmul.msk.bf16.gmra.mxu0 %vm66_vm0, %v45_v13  ;;  %vm296_vm0 = vcmask 1043456  }
  0x86   :  { %v82_v18 = vpop.f32.mrf.mxu0 }
  0x87   :  { %v564_v21 = vadd.f32 %v454_v19, %v82_v18 }
  0x8e   :  { %v84_v20 = vpop.f32.mrf.mxu0 }
  0x8f   :  { %v566_v22 = vadd.f32 %v454_v19, %v84_v20 }
  0x91   :  { %v94_v23 = vpack.c.bf16 %v566_v22, %v564_v21 }
  0x93   :  { %425 = vmatmul.msk.bf16.vlgmr.msra.gmra.mxu1 %vm97_vm1, %v94_v23 }
  0x96   :  { %v87_v24 = vpop.f32.mrf.mxu0 }
  0x97   :  { %v571_v26 = vadd.f32 %v454_v19, %v87_v24 }
  0x9e   :  { %v89_v25 = vpop.f32.mrf.mxu0 }
  0x9f   :  { %v573_v27 = vadd.f32 %v454_v19, %v89_v25 }
  0xa1   :  { %v95_v28 = vpack.c.bf16 %v573_v27, %v571_v26 }
  0xa3   :  { %426 = vmatmul.msk.bf16.gmra.mxu1 %vm97_vm1, %v95_v28 }
 0x110   :  { %v116_v30 = vpop.f32.mrf.mxu1 }
 0x111   :  { %v127_v31 = vmul.f32 2.0, %v116_v30  ;;  %v483_v30 = vmov 0.0  }
 0x113   :  { %v134_v32 = vsub.f32 %v455_v29, %v127_v31 }
 0x115   :  { %v141_v33 = vsel %vm140_vm2, %v134_v32, inf }
 0x116   :  { %142 = vmin.xlane.f32.xlu0 %v141_v33 }
 0x118   :  { %v118_v34 = vpop.f32.mrf.mxu1 }
 0x119   :  { %v128_v35 = vmul.f32 2.0, %v118_v34 }
 0x11b   :  { %v135_v36 = vsub.f32 %v455_v29, %v128_v35 }
 0x11d   :  { %v144_v37 = vsel %vm140_vm2, %v135_v36, inf }
 0x11e   :  { %145 = vmin.xlane.f32.xlu0 %v144_v37 }
 0x120   :  { %v121_v38 = vpop.f32.mrf.mxu1 }
 0x121   :  { %v129_v39 = vmul.f32 2.0, %v121_v38 }
 0x123   :  { %v136_v40 = vsub.f32 %v455_v29, %v129_v39 }
 0x125   :  { %v147_v41 = vsel %vm140_vm2, %v136_v40, inf }
 0x126   :  { %148 = vmin.xlane.f32.xlu1 %v147_v41 }
 0x128   :  { %v123_v42 = vpop.f32.mrf.mxu1 }
 0x129   :  { %v130_v43 = vmul.f32 2.0, %v123_v42 }
 0x12b   :  { %v137_v44 = vsub.f32 %v455_v29, %v130_v43 }
 0x12d   :  { %v150_v45 = vsel %vm140_vm2, %v137_v44, inf }
 0x12e   :  { %151 = vmin.xlane.f32.xlu1 %v150_v45 }
 0x189   :  { %v143_v48 = vpop.xlane.xlu0 %142 }
 0x18a   :  { %vm153_vm3 = vcmp.eq.f32.partialorder %v134_v32, %v143_v48 }
 0x18b   :  { %v157_v49 = vsel %vm153_vm3, %v586_v47, 16  ;;  %vm380_vm3 = vcmp.eq.s32.totalorder %v586_v47, 0 }
 0x18c   :  { %v161_v50 = vsel %vm140_vm2, %v157_v49, 2147483647 }
 0x18d   :  { %v163_v51 = vshra.s32 %v161_v50, 16  ;;  %v162_v4 = vand.u32 65535, %v161_v50 }
 0x18f   :  { %v165_v52 = vcvt.s32.f32 %v163_v51  ;;  %v164_v6 = vcvt.s32.f32 %v162_v4  ;;  %v285_v51 = vld [vmem:[%s669_s5] sm:$0xf]  ;;  %s484_s5 = smov [#allocation2]  }
 0x191   :  { %166 = vmin.xlane.f32.xlu2 %v165_v52  ;;  %v146_v53 = vpop.xlane.xlu0 %145 }
 0x192   :  { %vm154_vm4 = vcmp.eq.f32.partialorder %v135_v36, %v146_v53 }
 0x193   :  { %v158_v54 = vsel %vm154_vm4, %v586_v47, 16 }
 0x194   :  { %v176_v55 = vsel %vm140_vm2, %v158_v54, 2147483647 }
 0x195   :  { %v178_v56 = vshra.s32 %v176_v55, 16  ;;  %v177_v8 = vand.u32 65535, %v176_v55 }
 0x197   :  { %v180_v57 = vcvt.s32.f32 %v178_v56  ;;  %v179_v10 = vcvt.s32.f32 %v177_v8 }
 0x199   :  { %181 = vmin.xlane.f32.xlu2 %v180_v57  ;;  %v149_v58 = vpop.xlane.xlu1 %148 }
 0x19a   :  { %vm155_vm5 = vcmp.eq.f32.partialorder %v136_v40, %v149_v58 }
 0x19b   :  { %v159_v59 = vsel %vm155_vm5, %v586_v47, 16 }
 0x19c   :  { %v191_v60 = vsel %vm140_vm2, %v159_v59, 2147483647 }
 0x19d   :  { %v193_v61 = vshra.s32 %v191_v60, 16  ;;  %v192_v12 = vand.u32 65535, %v191_v60 }
 0x19f   :  { %v195_v62 = vcvt.s32.f32 %v193_v61  ;;  %v194_v14 = vcvt.s32.f32 %v192_v12 }
 0x1a1   :  { %196 = vmin.xlane.f32.xlu0 %v195_v62  ;;  %v152_v63 = vpop.xlane.xlu1 %151 }
 0x1a2   :  { %vm156_vm6 = vcmp.eq.f32.partialorder %v137_v44, %v152_v63 }
 0x1a3   :  { %v160_v0 = vsel %vm156_vm6, %v586_v47, 16 }
 0x1a4   :  { %v206_v1 = vsel %vm140_vm2, %v160_v0, 2147483647 }
 0x1a5   :  { %v208_v2 = vshra.s32 %v206_v1, 16  ;;  %v207_v16 = vand.u32 65535, %v206_v1 }
 0x1a7   :  { %v210_v3 = vcvt.s32.f32 %v208_v2  ;;  %v209_v18 = vcvt.s32.f32 %v207_v16 }
 0x1a9   :  { %211 = vmin.xlane.f32.xlu1 %v210_v3 }
 0x204   :  { %v167_v5 = vpop.xlane.xlu2 %166 }
 0x205   :  { %vm168_vm7 = vcmp.eq.f32.partialorder %v165_v52, %v167_v5  ;;  %v173_v20 = vcvt.f32.s32 %v167_v5  ;;  %v298_v52 = vsel %vm296_vm0, %v285_v51, 0 }
 0x206   :  { %v169_v7 = vsel %vm168_vm7, %v164_v6, inf  ;;  %307 = vmatpush.bf16.msra.mxu3 %v298_v52 }
 0x207   :  { %170 = vmin.xlane.f32.xlu2 %v169_v7  ;;  %v174_v24 = vshll.u32 %v173_v20, 16 }
 0x20c   :  { %v182_v9 = vpop.xlane.xlu2 %181 }
 0x20d   :  { %vm183_vm8 = vcmp.eq.f32.partialorder %v180_v57, %v182_v9  ;;  %v188_v29 = vcvt.f32.s32 %v182_v9 }
 0x20e   :  { %v184_v11 = vsel %vm183_vm8, %v179_v10, inf }
 0x20f   :  { %185 = vmin.xlane.f32.xlu0 %v184_v11  ;;  %v189_v33 = vshll.u32 %v188_v29, 16 }
 0x214   :  { %v197_v13 = vpop.xlane.xlu0 %196 }
 0x215   :  { %vm198_vm9 = vcmp.eq.f32.partialorder %v195_v62, %v197_v13  ;;  %v203_v36 = vcvt.f32.s32 %v197_v13 }
 0x216   :  { %v199_v15 = vsel %vm198_vm9, %v194_v14, inf }
 0x217   :  { %200 = vmin.xlane.f32.xlu1 %v199_v15  ;;  %v204_v39 = vshll.u32 %v203_v36, 16 }
 0x21c   :  { %v212_v17 = vpop.xlane.xlu1 %211 }
 0x21d   :  { %vm213_vm10 = vcmp.eq.f32.partialorder %v210_v3, %v212_v17  ;;  %v218_v42 = vcvt.f32.s32 %v212_v17 }
 0x21e   :  { %v214_v19 = vsel %vm213_vm10, %v209_v18, inf }
 0x21f   :  { %215 = vmin.xlane.f32.xlu2 %v214_v19  ;;  %v219_v45 = vshll.u32 %v218_v42, 16 }
 0x27a   :  { %v171_v23 = vpop.xlane.xlu2 %170 }
 0x27b   :  { %v172_v25 = vcvt.f32.s32 %v171_v23 }
 0x27d   :  { %v175_v28 = vadd.s32 %v174_v24, %v172_v25 }
 0x27f   :  { %279 = vst.msk [vmem:[%s673_s9] sm:$0xff] %vm278_vm11, %v175_v28  ;;  %vm221_vm12 = vcmp.eq.s32.totalorder %v586_v47, %v175_v28 }
 0x280   :  { %v427_v31 = vsel %vm221_vm12, 1.0, %v483_v30 }
 0x281   :  { %431 = vmatmul.msk.f32.vlgmr.msra.gmra.mxu2 %vm140_vm2, %v427_v31 }
 0x282   :  { %v186_v32 = vpop.xlane.xlu0 %185 }
 0x283   :  { %v187_v34 = vcvt.f32.s32 %v186_v32 }
 0x285   :  { %v190_v35 = vadd.s32 %v189_v33, %v187_v34 }
 0x287   :  { %280 = vst.msk [vmem:[%s673_s9 + $0x8] sm:$0xff] %vm278_vm11, %v190_v35  ;;  %vm222_vm13 = vcmp.eq.s32.totalorder %v586_v47, %v190_v35 }
 0x288   :  { %v428_v37 = vsel %vm222_vm13, 1.0, %v483_v30 }
 0x289   :  { %432 = vmatmul.msk.f32.gmra.mxu2 %vm140_vm2, %v428_v37 }
 0x28a   :  { %v201_v38 = vpop.xlane.xlu1 %200 }
 0x28b   :  { %v202_v40 = vcvt.f32.s32 %v201_v38 }
 0x28d   :  { %v205_v41 = vadd.s32 %v204_v39, %v202_v40 }
 0x28f   :  { %281 = vst.msk [vmem:[%s673_s9 + $0x10] sm:$0xff] %vm278_vm11, %v205_v41  ;;  %vm223_vm14 = vcmp.eq.s32.totalorder %v586_v47, %v205_v41 }
 0x290   :  { %v429_v43 = vsel %vm223_vm14, 1.0, %v483_v30 }
 0x291   :  { %433 = vmatmul.msk.f32.gmra.mxu2 %vm140_vm2, %v429_v43 }
 0x292   :  { %v216_v44 = vpop.xlane.xlu2 %215 }
 0x293   :  { %v217_v48 = vcvt.f32.s32 %v216_v44 }
 0x295   :  { %v220_v49 = vadd.s32 %v219_v45, %v217_v48 }
 0x297   :  { %282 = vst.msk [vmem:[%s673_s9 + $0x18] sm:$0xff] %vm278_vm11, %v220_v49  ;;  %vm224_vm15 = vcmp.eq.s32.totalorder %v586_v47, %v220_v49  ;;  %s389_s9 = sshll.u32 %s484_s5, 4  ;;  %s390_s9 = int_to_ptr.vmem [resolvable:$true] %s389_s9 }
 0x298   :  { %v430_v50 = vsel %vm224_vm15, 1.0, %v483_v30  ;;  %v329_v30 = vshrl.u32 %v138_v46, 7 }
 0x299   :  { %434 = vmatmul.msk.f32.gmra.mxu2 %vm140_vm2, %v430_v50 }
 0x29a   :  { %vm379_vm2 = vcmp.eq.s32.totalorder %v329_v30, 0 }
 0x29b   :  { %vm381_vm4 = vmand %vm379_vm2, %vm380_vm3 }
 0x304   :  { %v262_v53 = vpop.f32.mrf.mxu2 }
 0x305   :  { %274 = vst.msk [vmem:[#allocation2] sm:$0xff] %vm97_vm1, %v262_v53  ;;  %v339_v58 = vsub.f32 %v262_v53, %v564_v21 }
 0x307   :  { %v359_v61 = vmul.f32 %v339_v58, %v339_v58 }
 0x309   :  { %v363_v1 = vsel %vm97_vm1, %v359_v61, 0.0 }
 0x30c   :  { %v265_v54 = vpop.f32.mrf.mxu2 }
 0x30d   :  { %275 = vst.msk [vmem:[#allocation2 + $0x8] sm:$0xff] %vm97_vm1, %v265_v54  ;;  %v283_v55 = vpack.c.bf16 %v265_v54, %v262_v53  ;;  %v340_v56 = vsub.f32 %v265_v54, %v566_v22 }
 0x30f   :  { %435 = vmatmul.msk.bf16.vlgmr.msra.gmra.mxu3 %vm97_vm1, %v283_v55  ;;  %v360_v60 = vmul.f32 %v340_v56, %v340_v56 }
 0x311   :  { %v364_v63 = vsel %vm97_vm1, %v360_v60, 0.0 }
 0x312   :  { %v365_v21 = vadd.f32 %v364_v63, %v363_v1 }
 0x314   :  { %v268_v57 = vpop.f32.mrf.mxu2 }
 0x315   :  { %276 = vst.msk [vmem:[#allocation2 + $0x10] sm:$0xff] %vm97_vm1, %v268_v57  ;;  %v341_v59 = vsub.f32 %v268_v57, %v571_v26 }
 0x317   :  { %v361_v62 = vmul.f32 %v341_v59, %v341_v59 }
 0x319   :  { %v366_v3 = vsel %vm97_vm1, %v361_v62, 0.0 }
 0x31a   :  { %v367_v26 = vadd.f32 %v366_v3, %v365_v21 }
 0x31c   :  { %v271_v0 = vpop.f32.mrf.mxu2 }
 0x31d   :  { %277 = vst.msk [vmem:[#allocation2 + $0x18] sm:$0xff] %vm97_vm1, %v271_v0  ;;  %v284_v2 = vpack.c.bf16 %v271_v0, %v268_v57  ;;  %v342_v22 = vsub.f32 %v271_v0, %v573_v27  ;;  %v456_v27 = vld [vmem:[%s670_s6] ss:$0 sm:$0xff] }
 0x31e   :  { %397 = dma.vmem_to_hbm [thread:$0]  %s390_s9, 512, %s392_s16, [#allocation3], %s485_s17, %s485_s17, %s486_s18  }
 0x31f   :  { %v362_v4 = vmul.f32 %v342_v22, %v342_v22  ;;  %436 = vmatmul.msk.bf16.gmra.mxu3 %vm97_vm1, %v284_v2 }
 0x321   :  { %v368_v5 = vsel %vm97_vm1, %v362_v4, 0.0  ;;  %vm323_vm1 = vcmask 257024  }
 0x322   :  { %v369_v6 = vadd.f32 %v368_v5, %v367_v26 }
 0x324   :  { %370 = vadd.xlane.f32.xlu0 %v369_v6 }
 0x392   :  { %v309_v7 = vpop.f32.mrf.mxu3 }
 0x393   :  { %v310_v8 = vadd.f32 %v456_v27, %v309_v7 }
 0x395   :  { %v319_v9 = vpack.c.bf16 %v310_v8, %v310_v8 }
 0x397   :  { %324 = vst.msk [vmem:[%s672_s8] sm:$0xf] %vm323_vm1, %v319_v9  ;;  %v371_v10 = vpop.xlane.xlu0 %370 }
 0x398   :  { %v372_v11 = vrot.slane %v371_v10, 4 }
 0x39a   :  { %v373_v12 = vadd.f32 %v372_v11, %v371_v10  ;;  %v311_v13 = vpop.f32.mrf.mxu3 }
 0x39b   :  { %v312_v14 = vadd.f32 %v456_v27, %v311_v13 }
 0x39c   :  { %v374_v15 = vrot.slane %v373_v12, 2 }
 0x39d   :  { %v320_v16 = vpack.c.bf16 %v312_v14, %v312_v14 }
 0x39e   :  { %v375_v17 = vadd.f32 %v374_v15, %v373_v12 }
 0x39f   :  { %325 = vst.msk [vmem:[%s672_s8 + $0x4] sm:$0xf] %vm323_vm1, %v320_v16 }
 0x3a0   :  { %v376_v18 = vrot.slane %v375_v17, 1 }
 0x3a2   :  { %v314_v19 = vpop.f32.mrf.mxu3  ;;  %v377_v20 = vadd.f32 %v376_v18, %v375_v17 }
 0x3a3   :  { %v315_v23 = vadd.f32 %v456_v27, %v314_v19 }
 0x3a4   :  { %448 = vpush %v377_v20 }
 0x3a5   :  { %v321_v24 = vpack.c.bf16 %v315_v23, %v315_v23 }
 0x3a7   :  { %326 = vst.msk [vmem:[%s672_s8 + $0x8] sm:$0xf] %vm323_vm1, %v321_v24 }
 0x3aa   :  { %v316_v25 = vpop.f32.mrf.mxu3 }
 0x3ab   :  { %v317_v28 = vadd.f32 %v456_v27, %v316_v25 }
 0x3ad   :  { %v322_v29 = vpack.c.bf16 %v317_v28, %v317_v28 }
 0x3af   :  { %327 = vst.msk [vmem:[%s672_s8 + $0xc] sm:$0xf] %vm323_vm1, %v322_v29 }
 0x3d5   :  { %s449_s2 = spop %448 }
 0x3d6   :  { %v382_v31 = vstv %s449_s2 }
 0x3d7   :  { %v383_v32 = vsel %vm381_vm4, %v382_v31, 0.0 }
 0x3d8   :  { %384 = vst [vmem:[%s674_s10] sm:$0xff] %v383_v32 }
 0x3d9   :  { %481 = dma.done.wait [#allocation3], 512  }
 0x3da   :  { %482 = vsyncadd [#allocation3], 4294966784 }
 0x3db   :  { %414 = vsyncpa [#allocation3], 1 }

// kernel: squeeze.1
= control target key start
LH: loop header
LB: loop body
LE: loop exit
PB: predicated region body
PF: predicated region fallthrough
CT: control target
= control target key end

     0   :  { %s142_s0 = inlined_call_operand.vmem [shape: s32[32], index: 0, kind: input, shape index: {}]   ;;  %s143_s1 = inlined_call_operand.hbm [shape: s32[2,4,4], index: 1, kind: output, shape index: {}]  }
   0x1   :  { %v5_v0 = vld [vmem:[%s142_s0] sm:$0x1] }
   0x2   :  { %6 = vst [vmem:[#allocation3] sm:$0x1] %v5_v0 }
   0x3   :  { %2 = vsyncpa [#allocation1], 0  ;;  %s110_s0 = smov 124   ;;  %s111_s8 = smov 116   ;;  %vm8_vm0 = vcmask 31744  }
   0x4   :  { %s112_s9 = smov 108   ;;  %s113_s10 = smov 120  }
   0x5   :  { %s114_s11 = smov 112   ;;  %s115_s12 = smov 104  }
   0x6   :  { %s116_s13 = smov 100   ;;  %s117_s14 = smov [#allocation0]  }
   0x7   :  { %s67_s15 = sshll.u32 %s117_s14, 4  ;;  %s69_s1 = sshll.u32 %s143_s1, 4  ;;  %s68_s15 = int_to_ptr.vmem [resolvable:$true] %s67_s15  ;;  %s70_s1 = int_to_ptr.hbm [resolvable:$true] %s69_s1 }
   0x9   :  { %v10_v1 = vld [vmem:[#allocation3] sm:$0x1]  }
   0xa   :  { %v22_v2 = vld [vmem:[#allocation3] sm:$0x1]   ;;  %11 = vrot.lane.b32.xlu0 %v10_v1, %s110_s0 }
   0xb   :  { %23 = vrot.lane.b32.xlu1 %v22_v2, %s111_s8  ;;  %v34_v3 = vld [vmem:[#allocation3] sm:$0x1]  }
   0xc   :  { %35 = vrot.lane.b32.xlu2 %v34_v3, %s112_s9  ;;  %v16_v4 = vld [vmem:[#allocation3] sm:$0x1]  }
   0xd   :  { %v28_v5 = vld [vmem:[#allocation3] sm:$0x1]  }
   0xe   :  { %v40_v6 = vld [vmem:[#allocation3] sm:$0x1]  }
   0xf   :  { %v46_v7 = vld [vmem:[#allocation3] sm:$0x1]  }
  0x10   :  { %v7_v8 = vld [vmem:[#allocation3] sm:$0x1]  }
  0x11   :  { %9 = vst.msk [vmem:[#allocation2] sm:$0x1] %vm8_vm0, %v7_v8  }
  0x12   :  { %17 = vrot.lane.b32.xlu0 %v16_v4, %s113_s10 }
  0x13   :  { %29 = vrot.lane.b32.xlu1 %v28_v5, %s114_s11 }
  0x14   :  { %41 = vrot.lane.b32.xlu2 %v40_v6, %s115_s12 }
  0x1a   :  { %47 = vrot.lane.b32.xlu0 %v46_v7, %s116_s13 }
  0x66   :  { %v36_v9 = vpop.permute.xlu2 %35  }
  0x67   :  { %39 = vst.msk [vmem:[#allocation2 + $0x9] sm:$0x1] %vm8_vm0, %v36_v9  }
  0x6e   :  { %v42_v10 = vpop.permute.xlu2 %41  }
  0x6f   :  { %45 = vst.msk [vmem:[#allocation2 + $0xa] sm:$0x1] %vm8_vm0, %v42_v10  }
  0x7c   :  { %v12_v11 = vpop.permute.xlu0 %11  }
  0x7d   :  { %v24_v12 = vpop.permute.xlu1 %23   ;;  %15 = vst.msk [vmem:[#allocation2 + $0x1] sm:$0x1] %vm8_vm0, %v12_v11  }
  0x7e   :  { %27 = vst.msk [vmem:[#allocation2 + $0x3] sm:$0x1] %vm8_vm0, %v24_v12  }
  0x84   :  { %v18_v13 = vpop.permute.xlu0 %17  }
  0x85   :  { %v30_v14 = vpop.permute.xlu1 %29   ;;  %21 = vst.msk [vmem:[#allocation2 + $0x2] sm:$0x1] %vm8_vm0, %v18_v13  }
  0x86   :  { %33 = vst.msk [vmem:[#allocation2 + $0x8] sm:$0x1] %vm8_vm0, %v30_v14  }
  0x8c   :  { %v48_v15 = vpop.permute.xlu0 %47   ;;  %v54_v16 = vld [vmem:[#allocation2] sm:$0xf] }
  0x8d   :  { %51 = vst.msk [vmem:[#allocation2 + $0xb] sm:$0x1] %vm8_vm0, %v48_v15  }
  0x8e   :  { %57 = vst [vmem:[#allocation0] sm:$0xf] %v54_v16 }
  0x94   :  { %v59_v17 = vld [vmem:[#allocation2 + $0x8] sm:$0xf] }
  0x95   :  { %63 = vst [vmem:[#allocation0 + $0x4] sm:$0xf] %v59_v17 }
  0x96   :  { %72 = dma.vmem_to_hbm [thread:$0]  %s68_s15, 128, %s70_s1, [#allocation1]  }
  0x97   :  { %108 = dma.done.wait [#allocation1], 128  }
  0x98   :  { %109 = vsyncadd [#allocation1], 4294967168 }
  0x99   :  { %75 = vsyncpa [#allocation1], 1 }

// kernel: resnet_vqvae_forward.29
= control target key start
LH: loop header
LB: loop body
LE: loop exit
PB: predicated region body
PF: predicated region fallthrough
CT: control target
= control target key end

     0   :  { %vm179_vm0 = vcmask 130048   ;;  %vm302_vm1 = vcmask 97280   ;;  %s702_s1 = inlined_call_operand.vmem [shape: bf16[144,12], index: 1, kind: input, shape index: {}]   ;;  %s703_s0 = inlined_call_operand.vmem [shape: bf16[128,144], index: 0, kind: input, shape index: {}]   ;;  %s704_s2 = inlined_call_operand.vmem [shape: f32[1,12], index: 2, kind: input, shape index: {}]   ;;  %s705_s3 = inlined_call_operand.vmem [shape: f32[128,12], index: 3, kind: output, shape index: {}]  }
   0x1   :  { %v454_v0 = vld [vmem:[%s702_s1 + $0x38] sm:$0xff]  ;;  %v455_v1 = vld [vmem:[%s702_s1 + $0x40] sm:$0xff]  ;;  %v327_v3 = vld [vmem:[%s703_s0 + $0x8] sm:$0xf0] }
   0x2   :  { %v431_v2 = vld [vmem:[%s703_s0 + $0x4] sm:$0xf]  ;;  %204 = vmatpush.bf16.msra.mxu0 %v454_v0  ;;  %456 = vmatpush.bf16.msra.mxu2 %v454_v0  ;;  %v453_v5 = vld [vmem:[%s702_s1 + $0x30] sm:$0xff]  ;;  %v452_v6 = vld [vmem:[%s702_s1 + $0x28] sm:$0xff] }
   0x3   :  { %v330_v4 = vor.u32 %v431_v2, %v327_v3  ;;  %260 = vmatpush.bf16.msra.mxu1 %v455_v1  ;;  %464 = vmatpush.bf16.msra.mxu3 %v455_v1  ;;  %v441_v7 = vld [vmem:[%s703_s0 + $0x54] sm:$0xf]  ;;  %v367_v8 = vld [vmem:[%s703_s0 + $0x58] sm:$0xf0]  ;;  %v451_v10 = vld [vmem:[%s702_s1 + $0x20] sm:$0xff] }
   0x4   :  { %v370_v9 = vor.u32 %v441_v7, %v367_v8  ;;  %v450_v11 = vld [vmem:[%s702_s1 + $0x18] sm:$0xff]  ;;  %v433_v12 = vld [vmem:[%s703_s0 + $0x14] sm:$0xf]  ;;  %v448_v16 = vld [vmem:[%s702_s1 + $0x8] sm:$0xff] }
   0x5   :  { %v335_v13 = vld [vmem:[%s703_s0 + $0x18] sm:$0xf0]  ;;  %v449_v15 = vld [vmem:[%s702_s1 + $0x10] sm:$0xff]  ;;  %v443_v17 = vld [vmem:[%s703_s0 + $0x64] sm:$0xf] }
   0x6   :  { %423 = vmatmul.msk.bf16.vlgmr.msra.gmra.mxu1 %vm179_vm0, %v330_v4  ;;  %205 = vmatpush.bf16.msra.mxu0 %v453_v5  ;;  %v338_v14 = vor.u32 %v433_v12, %v335_v13  ;;  %v375_v18 = vld [vmem:[%s703_s0 + $0x68] sm:$0xf0]  ;;  %v447_v20 = vld [vmem:[%s702_s1] sm:$0xff]  ;;  %v432_v22 = vld [vmem:[%s703_s0 + $0x4] sm:$0xf0] }
   0x7   :  { %457 = vmatpush.bf16.msra.mxu2 %v453_v5  ;;  %428 = vmatmul.msk.bf16.vlgmr.msra.gmra.mxu3 %vm179_vm0, %v370_v9  ;;  %v378_v19 = vor.u32 %v443_v17, %v375_v18  ;;  %v325_v21 = vld [vmem:[%s703_s0] sm:$0xf]  ;;  %v440_v24 = vld [vmem:[%s703_s0 + $0x44] sm:$0xf0]  ;;  %v435_v27 = vld [vmem:[%s703_s0 + $0x24] sm:$0xf] }
   0x8   :  { %v357_v23 = vld [vmem:[%s703_s0 + $0x40] sm:$0xf]  ;;  %v326_v25 = vor.u32 %v432_v22, %v325_v21  ;;  %v343_v28 = vld [vmem:[%s703_s0 + $0x28] sm:$0xf0]  ;;  %v445_v30 = vld [vmem:[%s703_s0 + $0x74] sm:$0xf] }
   0x9   :  { %v358_v26 = vor.u32 %v440_v24, %v357_v23  ;;  %v346_v29 = vor.u32 %v435_v27, %v343_v28  ;;  %v383_v31 = vld [vmem:[%s703_s0 + $0x78] sm:$0xf0]  ;;  %v333_v33 = vld [vmem:[%s703_s0 + $0x10] sm:$0xf]  ;;  %v434_v34 = vld [vmem:[%s703_s0 + $0x14] sm:$0xf0] }
   0xa   :  { %206 = vmatpush.bf16.msra.mxu0 %v452_v6  ;;  %v386_v32 = vor.u32 %v445_v30, %v383_v31  ;;  %v365_v35 = vld [vmem:[%s703_s0 + $0x50] sm:$0xf]  ;;  %v442_v36 = vld [vmem:[%s703_s0 + $0x54] sm:$0xf0]  ;;  %v334_v37 = vor.u32 %v434_v34, %v333_v33  ;;  %v437_v39 = vld [vmem:[%s703_s0 + $0x34] sm:$0xf] }
   0xb   :  { %458 = vmatpush.bf16.msra.mxu2 %v452_v6  ;;  %v366_v38 = vor.u32 %v442_v36, %v365_v35  ;;  %v351_v40 = vld [vmem:[%s703_s0 + $0x38] sm:$0xf0]  ;;  %v341_v42 = vld [vmem:[%s703_s0 + $0x20] sm:$0xf]  ;;  %v436_v43 = vld [vmem:[%s703_s0 + $0x24] sm:$0xf0] }
   0xc   :  { %v354_v41 = vor.u32 %v437_v39, %v351_v40  ;;  %v373_v44 = vld [vmem:[%s703_s0 + $0x60] sm:$0xf]  ;;  %v444_v45 = vld [vmem:[%s703_s0 + $0x64] sm:$0xf0]  ;;  %v342_v46 = vor.u32 %v436_v43, %v341_v42  ;;  %v439_v48 = vld [vmem:[%s703_s0 + $0x44] sm:$0xf] }
   0xd   :  { %v374_v47 = vor.u32 %v444_v45, %v373_v44  ;;  %v359_v49 = vld [vmem:[%s703_s0 + $0x48] sm:$0xf0]  ;;  %v349_v51 = vld [vmem:[%s703_s0 + $0x30] sm:$0xf]  ;;  %v438_v52 = vld [vmem:[%s703_s0 + $0x34] sm:$0xf0] }
   0xe   :  { %207 = vmatpush.bf16.msra.mxu0 %v451_v10  ;;  %v362_v50 = vor.u32 %v439_v48, %v359_v49  ;;  %v381_v53 = vld [vmem:[%s703_s0 + $0x70] sm:$0xf]  ;;  %v446_v54 = vld [vmem:[%s703_s0 + $0x74] sm:$0xf0]  ;;  %v350_v55 = vor.u32 %v438_v52, %v349_v51  ;;  %v620_v61 = vld [vmem:[%s704_s2] ss:$0 sm:$0xff] }
   0xf   :  { %459 = vmatpush.bf16.msra.mxu2 %v451_v10  ;;  %v382_v56 = vor.u32 %v446_v54, %v381_v53 }
  0x12   :  { %208 = vmatpush.bf16.msra.mxu0 %v450_v11 }
  0x13   :  { %460 = vmatpush.bf16.msra.mxu2 %v450_v11 }
  0x16   :  { %424 = vmatmul.msk.bf16.gmra.mxu1 %vm179_vm0, %v338_v14  ;;  %209 = vmatpush.bf16.msra.mxu0 %v449_v15 }
  0x17   :  { %461 = vmatpush.bf16.msra.mxu2 %v449_v15  ;;  %429 = vmatmul.msk.bf16.gmra.mxu3 %vm179_vm0, %v378_v19 }
  0x1a   :  { %210 = vmatpush.bf16.msra.mxu0 %v448_v16 }
  0x1b   :  { %462 = vmatpush.bf16.msra.mxu2 %v448_v16 }
  0x1e   :  { %211 = vmatpush.bf16.msra.mxu0 %v447_v20 }
  0x1f   :  { %463 = vmatpush.bf16.msra.mxu2 %v447_v20 }
  0x21   :  { %212 = vmatmul.bf16.vlgmr.msra.gmra.mxu0 %v326_v25 }
  0x22   :  { %232 = vmatmul.bf16.vlgmr.msra.gmra.mxu2 %v358_v26 }
  0x26   :  { %425 = vmatmul.msk.bf16.gmra.mxu1 %vm179_vm0, %v346_v29 }
  0x27   :  { %430 = vmatmul.msk.bf16.gmra.mxu3 %vm179_vm0, %v386_v32 }
  0x31   :  { %217 = vmatmul.bf16.gmra.mxu0 %v334_v37 }
  0x32   :  { %237 = vmatmul.bf16.gmra.mxu2 %v366_v38 }
  0x36   :  { %426 = vmatmul.msk.bf16.gmra.mxu1 %vm179_vm0, %v354_v41 }
  0x41   :  { %222 = vmatmul.bf16.gmra.mxu0 %v342_v46 }
  0x42   :  { %242 = vmatmul.bf16.gmra.mxu2 %v374_v47 }
  0x46   :  { %427 = vmatmul.msk.bf16.gmra.mxu1 %vm179_vm0, %v362_v50 }
  0x51   :  { %227 = vmatmul.bf16.gmra.mxu0 %v350_v55 }
  0x52   :  { %247 = vmatmul.bf16.gmra.mxu2 %v382_v56 }
  0x83   :  { %v262_v57 = vpop.f32.mrf.mxu1 }
  0x8a   :  { %v287_v8 = vpop.f32.mrf.mxu3 }
  0x8b   :  { %v264_v58 = vpop.f32.mrf.mxu1 }
  0x92   :  { %v289_v17 = vpop.f32.mrf.mxu3 }
  0x93   :  { %v267_v59 = vpop.f32.mrf.mxu1 }
  0x9a   :  { %v292_v27 = vpop.f32.mrf.mxu3 }
  0x9b   :  { %v269_v60 = vpop.f32.mrf.mxu1 }
  0x9e   :  { %v213_v62 = vpop.f32.mrf.mxu0 }
  0x9f   :  { %v214_v63 = vadd.f32 %v620_v61, %v213_v62 }
  0xa1   :  { %v263_v0 = vadd.f32 %v262_v57, %v214_v63 }
  0xa2   :  { %v294_v38 = vpop.f32.mrf.mxu3 }
  0xa3   :  { %303 = vst.msk [vmem:[%s705_s3] sm:$0xff] %vm302_vm1, %v263_v0  ;;  %v272_v1 = vpop.f32.mrf.mxu1 }
  0xa5   :  { %v233_v2 = vpop.f32.mrf.mxu2 }
  0xa6   :  { %v215_v3 = vpop.f32.mrf.mxu0  ;;  %v234_v28 = vadd.f32 %v620_v61, %v233_v2 }
  0xa7   :  { %v216_v4 = vadd.f32 %v620_v61, %v215_v3 }
  0xa9   :  { %v265_v5 = vadd.f32 %v264_v58, %v216_v4 }
  0xaa   :  { %v297_v47 = vpop.f32.mrf.mxu3 }
  0xab   :  { %304 = vst.msk [vmem:[%s705_s3 + $0x8] sm:$0xff] %vm302_vm1, %v265_v5  ;;  %v274_v6 = vpop.f32.mrf.mxu1 }
  0xad   :  { %v235_v7 = vpop.f32.mrf.mxu2 }
  0xae   :  { %v218_v9 = vpop.f32.mrf.mxu0  ;;  %v236_v37 = vadd.f32 %v620_v61, %v235_v7 }
  0xaf   :  { %v219_v10 = vadd.f32 %v620_v61, %v218_v9 }
  0xb1   :  { %v268_v11 = vadd.f32 %v267_v59, %v219_v10 }
  0xb2   :  { %v299_v56 = vpop.f32.mrf.mxu3 }
  0xb3   :  { %305 = vst.msk [vmem:[%s705_s3 + $0x10] sm:$0xff] %vm302_vm1, %v268_v11  ;;  %v277_v12 = vpop.f32.mrf.mxu1 }
  0xb5   :  { %v238_v13 = vpop.f32.mrf.mxu2 }
  0xb6   :  { %v239_v14 = vadd.f32 %v620_v61, %v238_v13  ;;  %v220_v15 = vpop.f32.mrf.mxu0 }
  0xb7   :  { %v221_v16 = vadd.f32 %v620_v61, %v220_v15 }
  0xb8   :  { %v288_v18 = vadd.f32 %v287_v8, %v239_v14 }
  0xb9   :  { %v270_v19 = vadd.f32 %v269_v60, %v221_v16 }
  0xba   :  { %313 = vst.msk [vmem:[%s705_s3 + $0x50] sm:$0xff] %vm302_vm1, %v288_v18 }
  0xbb   :  { %306 = vst.msk [vmem:[%s705_s3 + $0x18] sm:$0xff] %vm302_vm1, %v270_v19  ;;  %v279_v20 = vpop.f32.mrf.mxu1 }
  0xbd   :  { %v240_v21 = vpop.f32.mrf.mxu2 }
  0xbe   :  { %v241_v22 = vadd.f32 %v620_v61, %v240_v21  ;;  %v223_v23 = vpop.f32.mrf.mxu0 }
  0xbf   :  { %v224_v24 = vadd.f32 %v620_v61, %v223_v23 }
  0xc0   :  { %v290_v25 = vadd.f32 %v289_v17, %v241_v22 }
  0xc1   :  { %v273_v26 = vadd.f32 %v272_v1, %v224_v24 }
  0xc2   :  { %314 = vst.msk [vmem:[%s705_s3 + $0x58] sm:$0xff] %vm302_vm1, %v290_v25 }
  0xc3   :  { %307 = vst.msk [vmem:[%s705_s3 + $0x20] sm:$0xff] %vm302_vm1, %v273_v26  ;;  %v282_v29 = vpop.f32.mrf.mxu1 }
  0xc4   :  { %v283_v30 = vadd.f32 %v282_v29, %v234_v28 }
  0xc5   :  { %v243_v31 = vpop.f32.mrf.mxu2 }
  0xc6   :  { %311 = vst.msk [vmem:[%s705_s3 + $0x40] sm:$0xff] %vm302_vm1, %v283_v30  ;;  %v244_v32 = vadd.f32 %v620_v61, %v243_v31  ;;  %v225_v33 = vpop.f32.mrf.mxu0 }
  0xc7   :  { %v226_v34 = vadd.f32 %v620_v61, %v225_v33 }
  0xc8   :  { %v293_v35 = vadd.f32 %v292_v27, %v244_v32 }
  0xc9   :  { %v275_v36 = vadd.f32 %v274_v6, %v226_v34 }
  0xca   :  { %315 = vst.msk [vmem:[%s705_s3 + $0x60] sm:$0xff] %vm302_vm1, %v293_v35 }
  0xcb   :  { %308 = vst.msk [vmem:[%s705_s3 + $0x28] sm:$0xff] %vm302_vm1, %v275_v36  ;;  %v284_v39 = vpop.f32.mrf.mxu1 }
  0xcc   :  { %v285_v40 = vadd.f32 %v284_v39, %v236_v37 }
  0xcd   :  { %v245_v41 = vpop.f32.mrf.mxu2 }
  0xce   :  { %312 = vst.msk [vmem:[%s705_s3 + $0x48] sm:$0xff] %vm302_vm1, %v285_v40  ;;  %v246_v42 = vadd.f32 %v620_v61, %v245_v41  ;;  %v228_v43 = vpop.f32.mrf.mxu0 }
  0xcf   :  { %v229_v44 = vadd.f32 %v620_v61, %v228_v43 }
  0xd0   :  { %v295_v45 = vadd.f32 %v294_v38, %v246_v42 }
  0xd1   :  { %v278_v46 = vadd.f32 %v277_v12, %v229_v44 }
  0xd2   :  { %316 = vst.msk [vmem:[%s705_s3 + $0x68] sm:$0xff] %vm302_vm1, %v295_v45 }
  0xd3   :  { %309 = vst.msk [vmem:[%s705_s3 + $0x30] sm:$0xff] %vm302_vm1, %v278_v46 }
  0xd5   :  { %v248_v48 = vpop.f32.mrf.mxu2 }
  0xd6   :  { %v249_v49 = vadd.f32 %v620_v61, %v248_v48  ;;  %v230_v50 = vpop.f32.mrf.mxu0 }
  0xd7   :  { %v231_v51 = vadd.f32 %v620_v61, %v230_v50 }
  0xd8   :  { %v298_v52 = vadd.f32 %v297_v47, %v249_v49 }
  0xd9   :  { %v280_v53 = vadd.f32 %v279_v20, %v231_v51 }
  0xda   :  { %317 = vst.msk [vmem:[%s705_s3 + $0x70] sm:$0xff] %vm302_vm1, %v298_v52 }
  0xdb   :  { %310 = vst.msk [vmem:[%s705_s3 + $0x38] sm:$0xff] %vm302_vm1, %v280_v53 }
  0xdd   :  { %v250_v54 = vpop.f32.mrf.mxu2 }
  0xde   :  { %v251_v55 = vadd.f32 %v620_v61, %v250_v54 }
  0xe0   :  { %v300_v57 = vadd.f32 %v299_v56, %v251_v55 }
  0xe2   :  { %318 = vst.msk [vmem:[%s705_s3 + $0x78] sm:$0xff] %vm302_vm1, %v300_v57 }

</bundles_post_ra>
